<compile_context>
chip_gen: v5e
topology: v5e:2x2
jax: 0.10.0
libtpu: 0.0.40
codegen_flags: <defaults>
</compile_context>

<pallas_src>
import numpy as np
import jax
import jax.numpy as jnp
from jax.experimental import pallas as pl
from jax.experimental.pallas import tpu as pltpu


def _round_up(x, m):
    return ((x + m - 1) // m) * m


# ----------------------------------------------------------------------------------------
# Pallas kernel: transposed pairwise cost + IoU matrices for one batch element.
# ----------------------------------------------------------------------------------------
def _make_cost_kernel(use_focal, use_fed_loss, alpha, gamma, w_class, w_bbox, w_giou):
    def kernel(logits_ref, pbT_ref, pnT_ref, gt_ref, gn_ref, onehot_ref,
               cost_ref, iou_ref):
        x = logits_ref[0]            # (Nq, C)   logits
        pbT = pbT_ref[0]             # (4, Nq)   pred boxes xyxy (absolute), transposed
        pnT = pnT_ref[0]             # (4, Nq)   pred boxes / image_size, transposed
        gt = gt_ref[0]               # (Ngt, 4)  gt boxes xyxy (absolute)
        gn = gn_ref[0]               # (Ngt, 4)  gt boxes / image_size_tgt
        onehot = onehot_ref[0]       # (Ngt, C)  one-hot of target labels (zero rows = pad)

        # ---- classification cost on logits directly (eps-free, fewer EUP passes) ----
        if use_focal:
            p = jax.nn.sigmoid(x)
            sp = jax.nn.softplus(x)          # = -log(1 - sigmoid(x))
            nls = sp - x                     # = -log(sigmoid(x)) = softplus(-x)
            if gamma == 2.0:
                pg = p * p
                qg = (1.0 - p) * (1.0 - p)
            else:
                pg = jnp.power(p, gamma)
                qg = jnp.power(1.0 - p, gamma)
            diff = alpha * qg * nls - (1.0 - alpha) * pg * sp        # pos - neg, (Nq, C)
        elif use_fed_loss:
            # softplus(-x) - softplus(x) == -x  (eps-free form of -log(p)+log(1-p))
            diff = -x
        else:
            diff = -jax.nn.softmax(x, axis=-1)

        # cost_class^T[g, q] = sum_c onehot[g, c] * diff[q, c]  -> (Ngt, Nq), MXU bf16.
        cost_class = jax.lax.dot_general(
            onehot.astype(jnp.bfloat16), diff.astype(jnp.bfloat16),
            dimension_numbers=(((1,), (1,)), ((), ())),
            preferred_element_type=jnp.float32)                       # (Ngt, Nq)

        # ---- pairwise geometry: queries on the lane axis, gt on the sublane axis ----
        px0 = pbT[0:1, :]; py0 = pbT[1:2, :]; px1 = pbT[2:3, :]; py1 = pbT[3:4, :]  # (1, Nq)
        gx0 = gt[:, 0:1]; gy0 = gt[:, 1:2]; gx1 = gt[:, 2:3]; gy1 = gt[:, 3:4]       # (Ngt, 1)

        pw = px1 - px0; ph = py1 - py0          # (1, Nq)
        gw = gx1 - gx0; gh = gy1 - gy0          # (Ngt, 1)

        iw = jnp.maximum(jnp.minimum(px1, gx1) - jnp.maximum(px0, gx0), 0.0)
        ih = jnp.maximum(jnp.minimum(py1, gy1) - jnp.maximum(py0, gy0), 0.0)
        inter = iw * ih                                              # (Ngt, Nq)
        union = pw * ph + gw * gh - inter
        # NOTE: padded-gt x padded-query entries can be 0/0 (NaN); host slices them off.
        iou = inter / union

        ew = jnp.maximum(px1, gx1) - jnp.minimum(px0, gx0)
        eh = jnp.maximum(py1, gy1) - jnp.minimum(py0, gy0)
        area_c = ew * eh
        giou = iou - (area_c - union) / area_c

        # ---- L1 cdist on pre-normalized boxes ----
        cost_bbox = (jnp.abs(pnT[0:1, :] - gn[:, 0:1]) +
                     jnp.abs(pnT[1:2, :] - gn[:, 1:2]) +
                     jnp.abs(pnT[2:3, :] - gn[:, 2:3]) +
                     jnp.abs(pnT[3:4, :] - gn[:, 3:4]))              # (Ngt, Nq)

        # ---- in-boxes / in-centers info (get_in_boxes_info) ----
        cx = (px0 + px1) * 0.5                                       # (1, Nq)
        cy = (py0 + py1) * 0.5
        gcx = (gx0 + gx1) * 0.5                                      # (Ngt, 1)
        gcy = (gy0 + gy1) * 0.5
        r = 2.5
        in_boxes = (cx > gx0) & (cx < gx1) & (cy > gy0) & (cy < gy1)                 # (Ngt,Nq)
        in_centers = ((cx > gcx - r * gw) & (cx < gcx + r * gw) &
                      (cy > gcy - r * gh) & (cy < gcy + r * gh))
        fg = (jnp.any(in_boxes, axis=0, keepdims=True) |
              jnp.any(in_centers, axis=0, keepdims=True))                           # (1, Nq)
        both = in_boxes & in_centers

        cost = w_bbox * cost_bbox + w_class * cost_class - w_giou * giou
        cost = jnp.where(both, cost, cost + 100.0)
        cost = jnp.where(fg, cost, cost + 10000.0)   # cost[~fg_mask] += 10000

        cost_ref[0] = cost
        iou_ref[0] = iou

    return kernel


def _pairwise_cost_pallas(logits, pb_T, pn_T, gt, gn, onehot, *,
                          use_focal, use_fed_loss, alpha, gamma,
                          w_class, w_bbox, w_giou):
    bs, Nq_pad, C = logits.shape
    Ngt_pad = gt.shape[1]
    kernel = _make_cost_kernel(use_focal, use_fed_loss, alpha, gamma,
                               w_class, w_bbox, w_giou)
    return pl.pallas_call(
        kernel,
        out_shape=(jax.ShapeDtypeStruct((bs, Ngt_pad, Nq_pad), jnp.float32),
                   jax.ShapeDtypeStruct((bs, Ngt_pad, Nq_pad), jnp.float32)),
        grid=(bs,),
        in_specs=[
            pl.BlockSpec((1, Nq_pad, C), lambda b: (b, 0, 0)),
            pl.BlockSpec((1, 4, Nq_pad), lambda b: (b, 0, 0)),
            pl.BlockSpec((1, 4, Nq_pad), lambda b: (b, 0, 0)),
            pl.BlockSpec((1, Ngt_pad, 4), lambda b: (b, 0, 0)),
            pl.BlockSpec((1, Ngt_pad, 4), lambda b: (b, 0, 0)),
            pl.BlockSpec((1, Ngt_pad, C), lambda b: (b, 0, 0)),
        ],
        out_specs=(
            pl.BlockSpec((1, Ngt_pad, Nq_pad), lambda b: (b, 0, 0)),
            pl.BlockSpec((1, Ngt_pad, Nq_pad), lambda b: (b, 0, 0)),
        ),
        compiler_params=pltpu.CompilerParams(dimension_semantics=("parallel",)),
    )(logits, pb_T, pn_T, gt, gn, onehot)


# ----------------------------------------------------------------------------------------
# dynamic_k_matching: sequential, data-dependent assignment — host glue (numpy).
# TODO(synk): dynamic top-k with per-gt data-dependent k and the while loop have no clean
#             Pallas equivalent; kept on host operating on the kernel-produced matrices.
# ----------------------------------------------------------------------------------------
def _dynamic_k_matching(cost, pair_wise_ious, num_gt, ota_k):
    cost = np.array(cost, dtype=np.float32, copy=True)
    ious = np.asarray(pair_wise_ious, dtype=np.float32)
    nq = cost.shape[0]
    matching_matrix = np.zeros_like(cost)
    n_candidate_k = min(ota_k, nq)
    topk_ious = -np.sort(-ious, axis=0)[:n_candidate_k]
    dynamic_ks = np.clip(topk_ious.sum(0).astype(np.int32), 1, None)
    for gt_idx in range(num_gt):
        k = int(dynamic_ks[gt_idx])
        pos_idx = np.argsort(cost[:, gt_idx], kind="stable")[:k]
        matching_matrix[pos_idx, gt_idx] = 1.0
    anchor_matching_gt = matching_matrix.sum(1)
    if (anchor_matching_gt > 1).sum() > 0:
        multi = anchor_matching_gt > 1
        cost_argmin = np.argmin(cost[multi], axis=1)
        matching_matrix[multi] *= 0.0
        matching_matrix[multi, cost_argmin] = 1.0
    while (matching_matrix.sum(0) == 0).any():
        matched_query_id = matching_matrix.sum(1) > 0
        cost[matched_query_id] += 100000.0
        unmatch_id = np.nonzero(matching_matrix.sum(0) == 0)[0]
        for gt_idx in unmatch_id:
            pos_idx = int(np.argmin(cost[:, gt_idx]))
            matching_matrix[pos_idx, gt_idx] = 1.0
        if (matching_matrix.sum(1) > 1).sum() > 0:
            multi = anchor_matching_gt > 1  # mirrors the original code (stale mask reuse)
            cost_argmin = np.argmin(cost[multi], axis=1)
            matching_matrix[multi] *= 0.0
            matching_matrix[multi, cost_argmin] = 1.0
    assert not (matching_matrix.sum(0) == 0).any()
    selected_query = matching_matrix.sum(1) > 0
    gt_indices = matching_matrix[selected_query].argmax(1)
    assert selected_query.sum() == len(gt_indices)
    cost = np.where(matching_matrix == 0, cost + np.float32(np.inf), cost)
    matched_query_id = np.argmin(cost, axis=0)
    return (selected_query, gt_indices), matched_query_id


# ----------------------------------------------------------------------------------------
# Matcher module (mirrors the PyTorch class; cfg fields are plain config, no weights).
# ----------------------------------------------------------------------------------------
class _NS:
    def __init__(self, **kw):
        self.__dict__.update(kw)


def make_cfg(use_fed_loss=False, ota_k=5, alpha=0.25, gamma=2.0):
    return _NS(MODEL=_NS(DiffusionDet=_NS(
        USE_FED_LOSS=use_fed_loss, OTA_K=ota_k, ALPHA=alpha, GAMMA=gamma)))


class HungarianMatcherDynamicK:
    def __init__(self, cfg, cost_class=1.0, cost_bbox=1.0, cost_giou=1.0,
                 cost_mask=1.0, use_focal=False, cost_height=1.0):
        self.cost_class = float(cost_class)
        self.cost_bbox = float(cost_bbox)
        self.cost_height = float(cost_height)
        self.cost_giou = float(cost_giou)
        self.use_focal = bool(use_focal)
        self.use_fed_loss = bool(cfg.MODEL.DiffusionDet.USE_FED_LOSS)
        self.ota_k = int(cfg.MODEL.DiffusionDet.OTA_K)
        if self.use_focal:
            self.focal_loss_alpha = float(cfg.MODEL.DiffusionDet.ALPHA)
            self.focal_loss_gamma = float(cfg.MODEL.DiffusionDet.GAMMA)
        else:
            self.focal_loss_alpha = 0.25
            self.focal_loss_gamma = 2.0
        assert cost_class != 0 or cost_bbox != 0 or cost_giou != 0, "all costs cant be 0"

    def forward(self, outputs, targets):
        pred_logits = np.asarray(outputs["pred_logits"], np.float32)
        pred_boxes = np.asarray(outputs["pred_boxes"], np.float32)
        bs, Nq, C = pred_logits.shape
        assert bs == len(targets)

        ngt = [int(np.asarray(t["labels"]).shape[0]) for t in targets]
        # Pad: queries (lane axis) to a multiple of 128 for dense stores,
        #      gt (sublane axis) to a multiple of 8.
        Nq_pad = _round_up(Nq, 128)
        Ngt_pad = _round_up(max(max(ngt), 1), 8)

        logits_p = np.zeros((bs, Nq_pad, C), np.float32)
        logits_p[:, :Nq, :] = pred_logits
        pb_T = np.zeros((bs, 4, Nq_pad), np.float32)
        pb_T[:, :, :Nq] = pred_boxes.transpose(0, 2, 1)
        pn_T = np.zeros((bs, 4, Nq_pad), np.float32)

        gt = np.zeros((bs, Ngt_pad, 4), np.float32)
        gn = np.zeros((bs, Ngt_pad, 4), np.float32)
        onehot = np.zeros((bs, Ngt_pad, C), np.float32)
        for b, t in enumerate(targets):
            n = ngt[b]
            img = np.asarray(t["image_size_xyxy"], np.float32)           # (4,)
            pn_T[b] = pb_T[b] / img[:, None]                             # pre-normalize preds
            if n == 0:
                continue
            bxyxy = np.asarray(t["boxes_xyxy"], np.float32)              # (n, 4)
            gt[b, :n] = bxyxy
            gn[b, :n] = bxyxy / np.asarray(t["image_size_xyxy_tgt"], np.float32)
            onehot[b, np.arange(n), np.asarray(t["labels"], np.int64)] = 1.0

        cost_T, ious_T = _pairwise_cost_pallas(
            jnp.asarray(logits_p), jnp.asarray(pb_T), jnp.asarray(pn_T),
            jnp.asarray(gt), jnp.asarray(gn), jnp.asarray(onehot),
            use_focal=self.use_focal, use_fed_loss=self.use_fed_loss,
            alpha=self.focal_loss_alpha, gamma=self.focal_loss_gamma,
            w_class=self.cost_class, w_bbox=self.cost_bbox, w_giou=self.cost_giou)
        cost_T = np.asarray(jax.block_until_ready(cost_T))   # (bs, Ngt_pad, Nq_pad)
        ious_T = np.asarray(jax.block_until_ready(ious_T))

        indices, matched_ids = [], []
        for b in range(bs):
            n = ngt[b]
            if n == 0:
                indices.append((np.zeros(Nq, dtype=bool), np.arange(0)))
                matched_ids.append(np.arange(0))
                continue
            cost_b = cost_T[b, :n, :Nq].T          # (Nq, n)
            ious_b = ious_T[b, :n, :Nq].T
            (sel, gt_idx), mqid = _dynamic_k_matching(cost_b, ious_b, n, self.ota_k)
            indices.append((sel, gt_idx))
            matched_ids.append(mqid)
        return indices, matched_ids

    __call__ = forward


# ----------------------------------------------------------------------------------------
if __name__ == "__main__":
    key = jax.random.PRNGKey(0)
    bs, Nq, C = 2, 128, 16
    W, H = 128.0, 96.0
    k1, k2, k3, k4 = jax.random.split(key, 4)

    pred_logits = jax.random.normal(k1, (bs, Nq, C), jnp.float32)
    cxy = jax.random.uniform(k2, (bs, Nq, 2), minval=0.0, maxval=1.0) * jnp.array([W, H])
    wh = jax.random.uniform(k3, (bs, Nq, 2), minval=0.05, maxval=0.4) * jnp.array([W, H])
    pred_boxes = jnp.concatenate([cxy - wh / 2, cxy + wh / 2], axis=-1)

    targets = []
    num_gts = [5, 7]
    gkeys = jax.random.split(k4, bs * 3)
    image_size_xyxy = np.array([W, H, W, H], np.float32)
    for b in range(bs):
        n = num_gts[b]
        kk1, kk2, kk3 = gkeys[3 * b], gkeys[3 * b + 1], gkeys[3 * b + 2]
        gcxy = jax.random.uniform(kk1, (n, 2), minval=0.2, maxval=0.8) * jnp.array([W, H])
        gwh = jax.random.uniform(kk2, (n, 2), minval=0.1, maxval=0.35) * jnp.array([W, H])
        boxes_xyxy = np.asarray(jnp.concatenate([gcxy - gwh / 2, gcxy + gwh / 2], axis=-1))
        labels = np.asarray(jax.random.randint(kk3, (n,), 0, C))
        boxes_cxcywh_norm = np.asarray(jnp.concatenate([gcxy, gwh], axis=-1)) / image_size_xyxy
        targets.append({
            "labels": labels,
            "boxes": boxes_cxcywh_norm,
            "boxes_xyxy": boxes_xyxy,
            "image_size_xyxy": image_size_xyxy,
            "image_size_xyxy_tgt": np.tile(image_size_xyxy[None], (n, 1)),
        })

    cfg = make_cfg(use_fed_loss=False, ota_k=5, alpha=0.25, gamma=2.0)
    matcher = HungarianMatcherDynamicK(cfg, cost_class=2.0, cost_bbox=5.0,
                                       cost_giou=2.0, use_focal=True)
    outputs = {"pred_logits": pred_logits, "pred_boxes": pred_boxes}

    indices, matched_ids = matcher(outputs, targets)

    # light sanity checks mirroring the module's invariants
    for b, ((sel, gt_idx), mq) in enumerate(zip(indices, matched_ids)):
        assert sel.shape == (Nq,) and sel.dtype == np.bool_
        assert int(sel.sum()) == len(gt_idx)
        assert mq.shape == (num_gts[b],)
        assert np.all((gt_idx >= 0) & (gt_idx < num_gts[b]))
        assert np.all((mq >= 0) & (mq < Nq))
    print("KERNEL_OK")
</pallas_src>

<mosaic_0001>
module attributes {stable_mosaic.version = 11 : i64} {
  func.func @kernel(%arg0: i32, %arg1: memref<1x128x16xf32, #tpu.memory_space<vmem>>, %arg2: memref<1x4x128xf32, #tpu.memory_space<vmem>>, %arg3: memref<1x4x128xf32, #tpu.memory_space<vmem>>, %arg4: memref<1x8x4xf32, #tpu.memory_space<vmem>>, %arg5: memref<1x8x4xf32, #tpu.memory_space<vmem>>, %arg6: memref<1x8x16xf32, #tpu.memory_space<vmem>>, %arg7: memref<1x8x128xf32, #tpu.memory_space<vmem>>, %arg8: memref<1x8x128xf32, #tpu.memory_space<vmem>>) attributes {dimension_semantics = [#tpu.dimension_semantics<parallel>], iteration_bounds = array<i64: 2>, scalar_prefetch = 0 : i64, scratch_operands = 0 : i64, tpu.core_type = #tpu.core_type<tc>, window_params = [{transform_indices = @transform_0, window_bounds = array<i64: 1, 128, 16>}, {transform_indices = @transform_1, window_bounds = array<i64: 1, 4, 128>}, {transform_indices = @transform_2, window_bounds = array<i64: 1, 4, 128>}, {transform_indices = @transform_3, window_bounds = array<i64: 1, 8, 4>}, {transform_indices = @transform_4, window_bounds = array<i64: 1, 8, 4>}, {transform_indices = @transform_5, window_bounds = array<i64: 1, 8, 16>}, {transform_indices = @transform_6, window_bounds = array<i64: 1, 8, 128>}, {transform_indices = @transform_7, window_bounds = array<i64: 1, 8, 128>}]} {
    %c0 = arith.constant 0 : index
    %c0_0 = arith.constant 0 : index
    %c0_1 = arith.constant 0 : index
    %0 = vector.load %arg1[%c0, %c0_0, %c0_1] : memref<1x128x16xf32, #tpu.memory_space<vmem>>, vector<1x128x16xf32>
    %1 = vector.shape_cast %0 : vector<1x128x16xf32> to vector<128x16xf32>
    %c0_2 = arith.constant 0 : index
    %c0_3 = arith.constant 0 : index
    %c0_4 = arith.constant 0 : index
    %2 = vector.load %arg2[%c0_2, %c0_3, %c0_4] : memref<1x4x128xf32, #tpu.memory_space<vmem>>, vector<1x4x128xf32>
    %3 = vector.shape_cast %2 : vector<1x4x128xf32> to vector<4x128xf32>
    %c0_5 = arith.constant 0 : index
    %c0_6 = arith.constant 0 : index
    %c0_7 = arith.constant 0 : index
    %4 = vector.load %arg3[%c0_5, %c0_6, %c0_7] : memref<1x4x128xf32, #tpu.memory_space<vmem>>, vector<1x4x128xf32>
    %5 = vector.shape_cast %4 : vector<1x4x128xf32> to vector<4x128xf32>
    %c0_8 = arith.constant 0 : index
    %c0_9 = arith.constant 0 : index
    %c0_10 = arith.constant 0 : index
    %6 = vector.load %arg4[%c0_8, %c0_9, %c0_10] : memref<1x8x4xf32, #tpu.memory_space<vmem>>, vector<1x8x4xf32>
    %7 = vector.shape_cast %6 : vector<1x8x4xf32> to vector<8x4xf32>
    %c0_11 = arith.constant 0 : index
    %c0_12 = arith.constant 0 : index
    %c0_13 = arith.constant 0 : index
    %8 = vector.load %arg5[%c0_11, %c0_12, %c0_13] : memref<1x8x4xf32, #tpu.memory_space<vmem>>, vector<1x8x4xf32>
    %9 = vector.shape_cast %8 : vector<1x8x4xf32> to vector<8x4xf32>
    %c0_14 = arith.constant 0 : index
    %c0_15 = arith.constant 0 : index
    %c0_16 = arith.constant 0 : index
    %10 = vector.load %arg6[%c0_14, %c0_15, %c0_16] : memref<1x8x16xf32, #tpu.memory_space<vmem>>, vector<1x8x16xf32>
    %11 = vector.shape_cast %10 : vector<1x8x16xf32> to vector<8x16xf32>
    %12 = arith.negf %1 : vector<128x16xf32>
    %13 = math.exp %12 : vector<128x16xf32>
    %cst = arith.constant 1.000000e+00 : f32
    %14 = vector.broadcast %cst : f32 to vector<128x16xf32>
    %15 = arith.addf %14, %13 : vector<128x16xf32>
    %16 = arith.divf %14, %15 : vector<128x16xf32>
    %cst_17 = arith.constant 0.000000e+00 : f32
    %17 = vector.broadcast %cst_17 : f32 to vector<128x16xf32>
    %18 = arith.maximumf %1, %17 : vector<128x16xf32>
    %19 = vector.broadcast %cst_17 : f32 to vector<128x16xf32>
    %20 = arith.subf %1, %19 : vector<128x16xf32>
    %21 = arith.cmpf one, %20, %20 : vector<128x16xf32>
    %22 = vector.broadcast %cst_17 : f32 to vector<128x16xf32>
    %23 = arith.addf %1, %22 : vector<128x16xf32>
    %24 = math.absf %20 : vector<128x16xf32>
    %cst_18 = arith.constant 0.000000e+00 : f32
    %25 = vector.broadcast %cst_18 : f32 to vector<128x16xf32>
    %26 = arith.subf %25, %24 : vector<128x16xf32>
    %27 = math.exp %26 : vector<128x16xf32>
    %28 = math.log1p %27 : vector<128x16xf32>
    %29 = arith.addf %18, %28 : vector<128x16xf32>
    %30 = arith.select %21, %23, %29 : vector<128x16xi1>, vector<128x16xf32>
    %31 = arith.subf %30, %1 : vector<128x16xf32>
    %32 = arith.mulf %16, %16 : vector<128x16xf32>
    %cst_19 = arith.constant 1.000000e+00 : f32
    %33 = vector.broadcast %cst_19 : f32 to vector<128x16xf32>
    %34 = arith.subf %33, %16 : vector<128x16xf32>
    %cst_20 = arith.constant 1.000000e+00 : f32
    %35 = vector.broadcast %cst_20 : f32 to vector<128x16xf32>
    %36 = arith.subf %35, %16 : vector<128x16xf32>
    %37 = arith.mulf %34, %36 : vector<128x16xf32>
    %cst_21 = arith.constant 2.500000e-01 : f32
    %38 = vector.broadcast %cst_21 : f32 to vector<128x16xf32>
    %39 = arith.mulf %38, %37 : vector<128x16xf32>
    %40 = arith.mulf %39, %31 : vector<128x16xf32>
    %cst_22 = arith.constant 7.500000e-01 : f32
    %41 = vector.broadcast %cst_22 : f32 to vector<128x16xf32>
    %42 = arith.mulf %41, %32 : vector<128x16xf32>
    %43 = arith.mulf %42, %30 : vector<128x16xf32>
    %44 = arith.subf %40, %43 : vector<128x16xf32>
    %45 = arith.truncf %11 : vector<8x16xf32> to vector<8x16xbf16>
    %46 = arith.truncf %44 : vector<128x16xf32> to vector<128x16xbf16>
    %cst_23 = arith.constant dense<0.000000e+00> : vector<8x128xf32>
    %47 = tpu.matmul %45, %46, %cst_23 {dimension_numbers = #tpu.dot_dimension_numbers<[1], [1], [0], [0], [0, 0, 1, 0], [], []>} : vector<8x16xbf16>, vector<128x16xbf16>, vector<8x128xf32> -> vector<8x128xf32>
    %48 = vector.extract_strided_slice %3 {offsets = [0, 0], sizes = [1, 128], strides = [1, 1]} : vector<4x128xf32> to vector<1x128xf32>
    %49 = vector.extract_strided_slice %3 {offsets = [1, 0], sizes = [1, 128], strides = [1, 1]} : vector<4x128xf32> to vector<1x128xf32>
    %50 = vector.extract_strided_slice %3 {offsets = [2, 0], sizes = [1, 128], strides = [1, 1]} : vector<4x128xf32> to vector<1x128xf32>
    %51 = vector.extract_strided_slice %3 {offsets = [3, 0], sizes = [1, 128], strides = [1, 1]} : vector<4x128xf32> to vector<1x128xf32>
    %52 = vector.extract_strided_slice %7 {offsets = [0, 0], sizes = [8, 1], strides = [1, 1]} : vector<8x4xf32> to vector<8x1xf32>
    %53 = vector.extract_strided_slice %7 {offsets = [0, 1], sizes = [8, 1], strides = [1, 1]} : vector<8x4xf32> to vector<8x1xf32>
    %54 = vector.extract_strided_slice %7 {offsets = [0, 2], sizes = [8, 1], strides = [1, 1]} : vector<8x4xf32> to vector<8x1xf32>
    %55 = vector.extract_strided_slice %7 {offsets = [0, 3], sizes = [8, 1], strides = [1, 1]} : vector<8x4xf32> to vector<8x1xf32>
    %56 = arith.subf %50, %48 : vector<1x128xf32>
    %57 = arith.subf %51, %49 : vector<1x128xf32>
    %58 = arith.subf %54, %52 : vector<8x1xf32>
    %59 = arith.subf %55, %53 : vector<8x1xf32>
    %60 = vector.broadcast %50 : vector<1x128xf32> to vector<8x128xf32>
    %61 = vector.broadcast %54 : vector<8x1xf32> to vector<8x128xf32>
    %62 = arith.minimumf %60, %61 : vector<8x128xf32>
    %63 = vector.broadcast %48 : vector<1x128xf32> to vector<8x128xf32>
    %64 = vector.broadcast %52 : vector<8x1xf32> to vector<8x128xf32>
    %65 = arith.maximumf %63, %64 : vector<8x128xf32>
    %66 = arith.subf %62, %65 : vector<8x128xf32>
    %cst_24 = arith.constant 0.000000e+00 : f32
    %67 = vector.broadcast %cst_24 : f32 to vector<8x128xf32>
    %68 = arith.maximumf %66, %67 : vector<8x128xf32>
    %69 = vector.broadcast %51 : vector<1x128xf32> to vector<8x128xf32>
    %70 = vector.broadcast %55 : vector<8x1xf32> to vector<8x128xf32>
    %71 = arith.minimumf %69, %70 : vector<8x128xf32>
    %72 = vector.broadcast %49 : vector<1x128xf32> to vector<8x128xf32>
    %73 = vector.broadcast %53 : vector<8x1xf32> to vector<8x128xf32>
    %74 = arith.maximumf %72, %73 : vector<8x128xf32>
    %75 = arith.subf %71, %74 : vector<8x128xf32>
    %cst_25 = arith.constant 0.000000e+00 : f32
    %76 = vector.broadcast %cst_25 : f32 to vector<8x128xf32>
    %77 = arith.maximumf %75, %76 : vector<8x128xf32>
    %78 = arith.mulf %68, %77 : vector<8x128xf32>
    %79 = arith.mulf %56, %57 : vector<1x128xf32>
    %80 = arith.mulf %58, %59 : vector<8x1xf32>
    %81 = vector.broadcast %79 : vector<1x128xf32> to vector<8x128xf32>
    %82 = vector.broadcast %80 : vector<8x1xf32> to vector<8x128xf32>
    %83 = arith.addf %81, %82 : vector<8x128xf32>
    %84 = arith.subf %83, %78 : vector<8x128xf32>
    %85 = arith.divf %78, %84 : vector<8x128xf32>
    %86 = vector.broadcast %50 : vector<1x128xf32> to vector<8x128xf32>
    %87 = vector.broadcast %54 : vector<8x1xf32> to vector<8x128xf32>
    %88 = arith.maximumf %86, %87 : vector<8x128xf32>
    %89 = vector.broadcast %48 : vector<1x128xf32> to vector<8x128xf32>
    %90 = vector.broadcast %52 : vector<8x1xf32> to vector<8x128xf32>
    %91 = arith.minimumf %89, %90 : vector<8x128xf32>
    %92 = arith.subf %88, %91 : vector<8x128xf32>
    %93 = vector.broadcast %51 : vector<1x128xf32> to vector<8x128xf32>
    %94 = vector.broadcast %55 : vector<8x1xf32> to vector<8x128xf32>
    %95 = arith.maximumf %93, %94 : vector<8x128xf32>
    %96 = vector.broadcast %49 : vector<1x128xf32> to vector<8x128xf32>
    %97 = vector.broadcast %53 : vector<8x1xf32> to vector<8x128xf32>
    %98 = arith.minimumf %96, %97 : vector<8x128xf32>
    %99 = arith.subf %95, %98 : vector<8x128xf32>
    %100 = arith.mulf %92, %99 : vector<8x128xf32>
    %101 = arith.subf %100, %84 : vector<8x128xf32>
    %102 = arith.divf %101, %100 : vector<8x128xf32>
    %103 = arith.subf %85, %102 : vector<8x128xf32>
    %104 = vector.extract_strided_slice %5 {offsets = [0, 0], sizes = [1, 128], strides = [1, 1]} : vector<4x128xf32> to vector<1x128xf32>
    %105 = vector.extract_strided_slice %9 {offsets = [0, 0], sizes = [8, 1], strides = [1, 1]} : vector<8x4xf32> to vector<8x1xf32>
    %106 = vector.broadcast %104 : vector<1x128xf32> to vector<8x128xf32>
    %107 = vector.broadcast %105 : vector<8x1xf32> to vector<8x128xf32>
    %108 = arith.subf %106, %107 : vector<8x128xf32>
    %109 = math.absf %108 : vector<8x128xf32>
    %110 = vector.extract_strided_slice %5 {offsets = [1, 0], sizes = [1, 128], strides = [1, 1]} : vector<4x128xf32> to vector<1x128xf32>
    %111 = vector.extract_strided_slice %9 {offsets = [0, 1], sizes = [8, 1], strides = [1, 1]} : vector<8x4xf32> to vector<8x1xf32>
    %112 = vector.broadcast %110 : vector<1x128xf32> to vector<8x128xf32>
    %113 = vector.broadcast %111 : vector<8x1xf32> to vector<8x128xf32>
    %114 = arith.subf %112, %113 : vector<8x128xf32>
    %115 = math.absf %114 : vector<8x128xf32>
    %116 = arith.addf %109, %115 : vector<8x128xf32>
    %117 = vector.extract_strided_slice %5 {offsets = [2, 0], sizes = [1, 128], strides = [1, 1]} : vector<4x128xf32> to vector<1x128xf32>
    %118 = vector.extract_strided_slice %9 {offsets = [0, 2], sizes = [8, 1], strides = [1, 1]} : vector<8x4xf32> to vector<8x1xf32>
    %119 = vector.broadcast %117 : vector<1x128xf32> to vector<8x128xf32>
    %120 = vector.broadcast %118 : vector<8x1xf32> to vector<8x128xf32>
    %121 = arith.subf %119, %120 : vector<8x128xf32>
    %122 = math.absf %121 : vector<8x128xf32>
    %123 = arith.addf %116, %122 : vector<8x128xf32>
    %124 = vector.extract_strided_slice %5 {offsets = [3, 0], sizes = [1, 128], strides = [1, 1]} : vector<4x128xf32> to vector<1x128xf32>
    %125 = vector.extract_strided_slice %9 {offsets = [0, 3], sizes = [8, 1], strides = [1, 1]} : vector<8x4xf32> to vector<8x1xf32>
    %126 = vector.broadcast %124 : vector<1x128xf32> to vector<8x128xf32>
    %127 = vector.broadcast %125 : vector<8x1xf32> to vector<8x128xf32>
    %128 = arith.subf %126, %127 : vector<8x128xf32>
    %129 = math.absf %128 : vector<8x128xf32>
    %130 = arith.addf %123, %129 : vector<8x128xf32>
    %131 = arith.addf %48, %50 : vector<1x128xf32>
    %cst_26 = arith.constant 5.000000e-01 : f32
    %132 = vector.broadcast %cst_26 : f32 to vector<1x128xf32>
    %133 = arith.mulf %131, %132 : vector<1x128xf32>
    %134 = arith.addf %49, %51 : vector<1x128xf32>
    %cst_27 = arith.constant 5.000000e-01 : f32
    %135 = vector.broadcast %cst_27 : f32 to vector<1x128xf32>
    %136 = arith.mulf %134, %135 : vector<1x128xf32>
    %137 = arith.addf %52, %54 : vector<8x1xf32>
    %cst_28 = arith.constant 5.000000e-01 : f32
    %138 = vector.broadcast %cst_28 : f32 to vector<8x1xf32>
    %139 = arith.mulf %137, %138 : vector<8x1xf32>
    %140 = arith.addf %53, %55 : vector<8x1xf32>
    %cst_29 = arith.constant 5.000000e-01 : f32
    %141 = vector.broadcast %cst_29 : f32 to vector<8x1xf32>
    %142 = arith.mulf %140, %141 : vector<8x1xf32>
    %143 = vector.broadcast %133 : vector<1x128xf32> to vector<8x128xf32>
    %144 = vector.broadcast %52 : vector<8x1xf32> to vector<8x128xf32>
    %145 = arith.cmpf ogt, %143, %144 : vector<8x128xf32>
    %146 = vector.broadcast %133 : vector<1x128xf32> to vector<8x128xf32>
    %147 = vector.broadcast %54 : vector<8x1xf32> to vector<8x128xf32>
    %148 = arith.cmpf olt, %146, %147 : vector<8x128xf32>
    %149 = arith.andi %145, %148 : vector<8x128xi1>
    %150 = vector.broadcast %136 : vector<1x128xf32> to vector<8x128xf32>
    %151 = vector.broadcast %53 : vector<8x1xf32> to vector<8x128xf32>
    %152 = arith.cmpf ogt, %150, %151 : vector<8x128xf32>
    %153 = arith.andi %149, %152 : vector<8x128xi1>
    %154 = vector.broadcast %136 : vector<1x128xf32> to vector<8x128xf32>
    %155 = vector.broadcast %55 : vector<8x1xf32> to vector<8x128xf32>
    %156 = arith.cmpf olt, %154, %155 : vector<8x128xf32>
    %157 = arith.andi %153, %156 : vector<8x128xi1>
    %cst_30 = arith.constant 2.500000e+00 : f32
    %158 = vector.broadcast %cst_30 : f32 to vector<8x1xf32>
    %159 = arith.mulf %158, %58 : vector<8x1xf32>
    %160 = arith.subf %139, %159 : vector<8x1xf32>
    %161 = vector.broadcast %133 : vector<1x128xf32> to vector<8x128xf32>
    %162 = vector.broadcast %160 : vector<8x1xf32> to vector<8x128xf32>
    %163 = arith.cmpf ogt, %161, %162 : vector<8x128xf32>
    %cst_31 = arith.constant 2.500000e+00 : f32
    %164 = vector.broadcast %cst_31 : f32 to vector<8x1xf32>
    %165 = arith.mulf %164, %58 : vector<8x1xf32>
    %166 = arith.addf %139, %165 : vector<8x1xf32>
    %167 = vector.broadcast %133 : vector<1x128xf32> to vector<8x128xf32>
    %168 = vector.broadcast %166 : vector<8x1xf32> to vector<8x128xf32>
    %169 = arith.cmpf olt, %167, %168 : vector<8x128xf32>
    %170 = arith.andi %163, %169 : vector<8x128xi1>
    %cst_32 = arith.constant 2.500000e+00 : f32
    %171 = vector.broadcast %cst_32 : f32 to vector<8x1xf32>
    %172 = arith.mulf %171, %59 : vector<8x1xf32>
    %173 = arith.subf %142, %172 : vector<8x1xf32>
    %174 = vector.broadcast %136 : vector<1x128xf32> to vector<8x128xf32>
    %175 = vector.broadcast %173 : vector<8x1xf32> to vector<8x128xf32>
    %176 = arith.cmpf ogt, %174, %175 : vector<8x128xf32>
    %177 = arith.andi %170, %176 : vector<8x128xi1>
    %cst_33 = arith.constant 2.500000e+00 : f32
    %178 = vector.broadcast %cst_33 : f32 to vector<8x1xf32>
    %179 = arith.mulf %178, %59 : vector<8x1xf32>
    %180 = arith.addf %142, %179 : vector<8x1xf32>
    %181 = vector.broadcast %136 : vector<1x128xf32> to vector<8x128xf32>
    %182 = vector.broadcast %180 : vector<8x1xf32> to vector<8x128xf32>
    %183 = arith.cmpf olt, %181, %182 : vector<8x128xf32>
    %184 = arith.andi %177, %183 : vector<8x128xi1>
    %cst_34 = arith.constant 1.000000e+00 : f32
    %cst_35 = arith.constant 0.000000e+00 : f32
    %185 = vector.broadcast %cst_34 : f32 to vector<8x128xf32>
    %186 = vector.broadcast %cst_35 : f32 to vector<8x128xf32>
    %187 = arith.select %157, %185, %186 : vector<8x128xi1>, vector<8x128xf32>
    %cst_36 = arith.constant dense<0xFF800000> : vector<128xf32>
    %188 = vector.multi_reduction <maximumf>, %187, %cst_36 [0] : vector<8x128xf32> to vector<128xf32>
    %cst_37 = arith.constant 0.000000e+00 : f32
    %189 = vector.broadcast %cst_37 : f32 to vector<128xf32>
    %190 = arith.cmpf ogt, %188, %189 : vector<128xf32>
    %191 = vector.shape_cast %190 : vector<128xi1> to vector<1x128xi1>
    %cst_38 = arith.constant 1.000000e+00 : f32
    %cst_39 = arith.constant 0.000000e+00 : f32
    %192 = vector.broadcast %cst_38 : f32 to vector<8x128xf32>
    %193 = vector.broadcast %cst_39 : f32 to vector<8x128xf32>
    %194 = arith.select %184, %192, %193 : vector<8x128xi1>, vector<8x128xf32>
    %cst_40 = arith.constant dense<0xFF800000> : vector<128xf32>
    %195 = vector.multi_reduction <maximumf>, %194, %cst_40 [0] : vector<8x128xf32> to vector<128xf32>
    %cst_41 = arith.constant 0.000000e+00 : f32
    %196 = vector.broadcast %cst_41 : f32 to vector<128xf32>
    %197 = arith.cmpf ogt, %195, %196 : vector<128xf32>
    %198 = vector.shape_cast %197 : vector<128xi1> to vector<1x128xi1>
    %199 = arith.ori %191, %198 : vector<1x128xi1>
    %200 = arith.andi %157, %184 : vector<8x128xi1>
    %cst_42 = arith.constant 5.000000e+00 : f32
    %201 = vector.broadcast %cst_42 : f32 to vector<8x128xf32>
    %202 = arith.mulf %201, %130 : vector<8x128xf32>
    %cst_43 = arith.constant 2.000000e+00 : f32
    %203 = vector.broadcast %cst_43 : f32 to vector<8x128xf32>
    %204 = arith.mulf %203, %47 : vector<8x128xf32>
    %205 = arith.addf %202, %204 : vector<8x128xf32>
    %cst_44 = arith.constant 2.000000e+00 : f32
    %206 = vector.broadcast %cst_44 : f32 to vector<8x128xf32>
    %207 = arith.mulf %206, %103 : vector<8x128xf32>
    %208 = arith.subf %205, %207 : vector<8x128xf32>
    %cst_45 = arith.constant 1.000000e+02 : f32
    %209 = vector.broadcast %cst_45 : f32 to vector<8x128xf32>
    %210 = arith.addf %208, %209 : vector<8x128xf32>
    %211 = arith.select %200, %208, %210 : vector<8x128xi1>, vector<8x128xf32>
    %cst_46 = arith.constant 1.000000e+04 : f32
    %212 = vector.broadcast %cst_46 : f32 to vector<8x128xf32>
    %213 = arith.addf %211, %212 : vector<8x128xf32>
    %214 = vector.shape_cast %199 : vector<1x128xi1> to vector<1x128xi1>
    %215 = vector.broadcast %214 : vector<1x128xi1> to vector<8x128xi1>
    %216 = arith.select %215, %211, %213 : vector<8x128xi1>, vector<8x128xf32>
    %c0_47 = arith.constant 0 : index
    %c0_48 = arith.constant 0 : index
    %c0_49 = arith.constant 0 : index
    %217 = vector.load %arg7[%c0_47, %c0_48, %c0_49] : memref<1x8x128xf32, #tpu.memory_space<vmem>>, vector<1x8x128xf32>
    %218 = vector.shape_cast %217 : vector<1x8x128xf32> to vector<8x128xf32>
    %219 = vector.shape_cast %216 : vector<8x128xf32> to vector<1x8x128xf32>
    tpu.vector_store %arg7[%c0_47, %c0_48, %c0_49], %219 {strides = array<i32>} : memref<1x8x128xf32, #tpu.memory_space<vmem>>, vector<1x8x128xf32>,
    %c0_50 = arith.constant 0 : index
    %c0_51 = arith.constant 0 : index
    %c0_52 = arith.constant 0 : index
    %220 = vector.load %arg8[%c0_50, %c0_51, %c0_52] : memref<1x8x128xf32, #tpu.memory_space<vmem>>, vector<1x8x128xf32>
    %221 = vector.shape_cast %220 : vector<1x8x128xf32> to vector<8x128xf32>
    %222 = vector.shape_cast %85 : vector<8x128xf32> to vector<1x8x128xf32>
    tpu.vector_store %arg8[%c0_50, %c0_51, %c0_52], %222 {strides = array<i32>} : memref<1x8x128xf32, #tpu.memory_space<vmem>>, vector<1x8x128xf32>,
    return
  }
  func.func @transform_0(%arg0: i32) -> (i32, i32, i32) {
    %c0_i32 = arith.constant 0 : i32
    %c0_i32_0 = arith.constant 0 : i32
    %c0_i32_1 = arith.constant 0 : i32
    return %arg0, %c0_i32, %c0_i32_0 : i32, i32, i32
  }
  func.func @transform_1(%arg0: i32) -> (i32, i32, i32) {
    %c0_i32 = arith.constant 0 : i32
    %c0_i32_0 = arith.constant 0 : i32
    %c0_i32_1 = arith.constant 0 : i32
    return %arg0, %c0_i32, %c0_i32_0 : i32, i32, i32
  }
  func.func @transform_2(%arg0: i32) -> (i32, i32, i32) {
    %c0_i32 = arith.constant 0 : i32
    %c0_i32_0 = arith.constant 0 : i32
    %c0_i32_1 = arith.constant 0 : i32
    return %arg0, %c0_i32, %c0_i32_0 : i32, i32, i32
  }
  func.func @transform_3(%arg0: i32) -> (i32, i32, i32) {
    %c0_i32 = arith.constant 0 : i32
    %c0_i32_0 = arith.constant 0 : i32
    %c0_i32_1 = arith.constant 0 : i32
    return %arg0, %c0_i32, %c0_i32_0 : i32, i32, i32
  }
  func.func @transform_4(%arg0: i32) -> (i32, i32, i32) {
    %c0_i32 = arith.constant 0 : i32
    %c0_i32_0 = arith.constant 0 : i32
    %c0_i32_1 = arith.constant 0 : i32
    return %arg0, %c0_i32, %c0_i32_0 : i32, i32, i32
  }
  func.func @transform_5(%arg0: i32) -> (i32, i32, i32) {
    %c0_i32 = arith.constant 0 : i32
    %c0_i32_0 = arith.constant 0 : i32
    %c0_i32_1 = arith.constant 0 : i32
    return %arg0, %c0_i32, %c0_i32_0 : i32, i32, i32
  }
  func.func @transform_6(%arg0: i32) -> (i32, i32, i32) {
    %c0_i32 = arith.constant 0 : i32
    %c0_i32_0 = arith.constant 0 : i32
    %c0_i32_1 = arith.constant 0 : i32
    return %arg0, %c0_i32, %c0_i32_0 : i32, i32, i32
  }
  func.func @transform_7(%arg0: i32) -> (i32, i32, i32) {
    %c0_i32 = arith.constant 0 : i32
    %c0_i32_0 = arith.constant 0 : i32
    %c0_i32_1 = arith.constant 0 : i32
    return %arg0, %c0_i32, %c0_i32_0 : i32, i32, i32
  }
}

</mosaic_0001>

<bundles_post_ra>
// kernel: tpu_custom_call.1
= control target key start
LH: loop header
LB: loop body
LE: loop exit
PB: predicated region body
PF: predicated region fallthrough
CT: control target
= control target key end

     0   :  { %13 = vsyncpa [#allocation3], 0  ;;  %s2847_s0 = inlined_call_operand.vmem [shape: f32[2,128,16], index: 0, kind: input, shape index: {}]   ;;  %s2848_s1 = inlined_call_operand.vmem [shape: f32[2,4,128], index: 1, kind: input, shape index: {}]   ;;  %s2849_s2 = inlined_call_operand.vmem [shape: f32[2,4,128], index: 2, kind: input, shape index: {}]   ;;  %s2850_s3 = inlined_call_operand.vmem [shape: f32[2,8,4], index: 3, kind: input, shape index: {}]   ;;  %s2851_s4 = inlined_call_operand.vmem [shape: f32[2,8,4], index: 4, kind: input, shape index: {}]   ;;  %s2852_s5 = inlined_call_operand.vmem [shape: f32[2,8,16], index: 5, kind: input, shape index: {}]   ;;  %s2853_s6 = inlined_call_operand.hbm [shape: f32[2,8,128], index: 6, kind: output, shape index: {0}]   ;;  %s2854_s7 = inlined_call_operand.hbm [shape: f32[2,8,128], index: 7, kind: output, shape index: {1}]  }
   0x1   :  { %15 = vsyncpa [#allocation3 + $0x1], 0 }
   0x2   :  { %16 = vsyncpa [#allocation5], 0 }
   0x3   :  { %18 = vsyncpa [#allocation5 + $0x1], 0  ;;  %s1952_s24 = smov 0   ;;  %s1954_s25 = smov 0  }
   0x4   :  { %s1956_s26 = smov 0   ;;  %s1958_s27 = smov 0  }
   0x5 LB: > { %s1973_s28 = sadd.s32 4294967295, %s1902_s27   ;;  %s1574_s29 = sadd.s32 4294967294, %s1902_s27   ;;  %s1902_s27 = sphi %s1958_s27, %s2958_s27   ;;  %s1898_s26 = sphi %s1956_s26, %s2957_s26   ;;  %s1894_s25 = sphi %s1954_s25, %s2956_s25   ;;  %s1890_s24 = sphi %s1952_s24, %s2955_s24  }
   0x6   : > { %s1977_s30 = sadd.s32 1, %s1902_s27   ;;  %s187_s8 = sadd.s32 1, %s1898_s26 }
   0x7   : > { %s184_s9 = ssub.s32 %s1902_s27, %s1977_s30  ;;  %p197_p0 = scmp.ne.s32.totalorder %s1898_s26, %s1894_s25 }
   0x8   : > { %p185_p1 = scmp.eq.s32.totalorder %s184_s9, 0  ;;  %p198_p2 = scmp.eq.s32.totalorder %s1973_s28, 1 }
   0x9   : > { %p203_p3 = scmp.ne.s32.totalorder %s1894_s25, %s1890_s24  ;;  %p204_p4 = scmp.eq.s32.totalorder %s1574_s29, 1 }
   0xa   : > { %s1988_s10 = scalar_select %p185_p1, %s1898_s26, %s187_s8  }
   0xb   : > { %p1990_p5 = por %p198_p2, %p197_p0  ;;  %p1994_p6 = por %p204_p4, %p203_p3 }
   0xc   : > { %p1577_p7 = scmp.ge.s32.totalorder %s1902_s27, 1  ;;  %p291_p8 = scmp.lt.s32.totalorder %s1902_s27, 3 }
   0xe   : > { %p292_p9 = pnand %p1577_p7, %p291_p8 }
   0xf   : > { %p348_p10 = scmp.lt.s32.totalorder (!%p292_p9), %s1973_s28, 1  ;;  %s1904_s18 = smov (!%p292_p9), 2  }
  0x10   : > { %295 = sbr.rel (%p292_p9) target bundleno = 435 (0x1b3), region = 44  ;;  %s1905_s19 = smov (!%p292_p9), 126  }
  0x11   : > { %s1906_s29 = smov (!%p292_p9), 127  }
  0x15   : > { %s2002_s13 = scalar_select %p348_p10, %s1973_s28, 1  ;;  %vm1139_vm12 = vcmask 130048  }
  0x17   : > { %s2005_s14 = sshll.u32 %s2002_s13, 3  ;;  %s1610_s20 = sshll.u32 %s2002_s13, 7 }
  0x18   : > { %s2011_s17 = scalar_lea.vmem %s2850_s3, %s2005_s14  ;;  %s2023_s23 = scalar_lea.vmem %s2847_s0, %s1610_s20 }
  0x19   : > { %v2014_v0 = vld [vmem:[%s2011_s17] sm:$0xff]  ;;  %v2026_v1 = vld [vmem:[%s2023_s23 + $0x70] sm:$0xff]  ;;  %v2029_v2 = vld [vmem:[%s2023_s23 + $0x78] sm:$0xff]  ;;  %s368_s15 = scalar_lea.vmem %s2851_s4, %s2005_s14  ;;  %s1582_s16 = sshll.u32 %s2002_s13, 2 }
  0x1a   : > { %1185 = vrot.lane.b32.xlu0 %v2014_v0, %s1904_s18  ;;  %1310 = vrot.lane.b32.xlu1 %v2014_v0, %s1905_s19  ;;  %v1601_v3 = vmul.f32 -1.442695, %v2026_v1  ;;  %v1602_v4 = vmul.f32 -1.442695, %v2029_v2  ;;  %v760_v5 = vand.u32 2147483647, %v2026_v1  ;;  %vm728_vm2 = vcmp.ne.f32.partialorder %v2026_v1, %v2026_v1  ;;  %s372_s22 = scalar_lea.vmem %s2852_s5, %s2005_s14 }
  0x1b   : > { %v761_v6 = vand.u32 2147483647, %v2029_v2  ;;  %v2036_v15 = vld [vmem:[%s2023_s23 + $0x60] sm:$0xff]  ;;  %v2039_v17 = vld [vmem:[%s2023_s23 + $0x68] sm:$0xff]  ;;  %v712_v22 = vmax.f32 %v2026_v1, 0.0  ;;  %v713_v23 = vmax.f32 %v2029_v2, 0.0  ;;  %vm729_vm3 = vcmp.ne.f32.partialorder %v2029_v2, %v2029_v2 }
  0x1c   : > { %1675 = vpow2.f32 %v1601_v3  ;;  %v776_v7 = vsub.f32 0.0, %v760_v5  ;;  %v1599_v21 = vmul.f32 -1.442695, %v2036_v15  ;;  %v1600_v27 = vmul.f32 -1.442695, %v2039_v17  ;;  %s2737_s14 = sand.u32 1, %s1894_s25  }
  0x1d   : > { %1677 = vpow2.f32 %v1602_v4  ;;  %v777_v8 = vsub.f32 0.0, %v761_v6  ;;  %v758_v42 = vand.u32 2147483647, %v2036_v15  ;;  %v759_v43 = vand.u32 2147483647, %v2039_v17  ;;  %s1393_s20 = scalar_lea.sflag [#allocation5], %s2737_s14 }
  0x1e   : > { %v806_v9 = vmul.f32 1.442695, %v776_v7  ;;  %v711_v46 = vmax.f32 %v2039_v17, 0.0 }
  0x1f   : > { %v808_v10 = vmul.f32 1.442695, %v777_v8  ;;  %v774_v63 = vsub.f32 0.0, %v758_v42  ;;  %v775_v3 = vsub.f32 0.0, %v759_v43 }
  0x20   : > { %1679 = vpow2.f32 %v806_v9 }
  0x21   : > { %1681 = vpow2.f32 %v808_v10  ;;  %v804_v43 = vmul.f32 1.442695, %v775_v3 }
  0x22   : > { %v1676_v11 = vpop.eup %1675 }
  0x23   : > { %v1678_v12 = vpop.eup %1677  ;;  %v456_v13 = vadd.f32 1.0, %v1676_v11 }
  0x24   : > { %v457_v14 = vadd.f32 1.0, %v1678_v12 }
  0x25   : > { %1683 = vrcp.f32 %v456_v13  ;;  %vm673_vm0 = vweird.f32 %v456_v13  ;;  %v677_v29 = vand.u32 2147483647, %v456_v13  ;;  %v679_v30 = vand.u32 2147483648, %v456_v13 }
  0x26   : > { %1685 = vrcp.f32 %v457_v14  ;;  %v1680_v16 = vpop.eup %1679  ;;  %vm688_vm1 = vweird.f32 %v457_v14  ;;  %v692_v36 = vand.u32 2147483647, %v457_v14  ;;  %v694_v37 = vand.u32 2147483648, %v457_v14 }
  0x27   : > { %v1682_v18 = vpop.eup %1681  ;;  %v936_v19 = vadd.f32 1.0, %v1680_v16  ;;  %v939_v20 = vmul.f32 -0.5, %v1680_v16  ;;  %v942_v33 = vand.u32 2147483647, %v1680_v16  ;;  %vm2051_vm6 = vcmp.eq.f32.partialorder %v677_v29, 8.507059e+37  ;;  %v2112_v29 = vld [vmem:[%s2023_s23 + $0x58] sm:$0xff] }
  0x28   : > { %v945_v24 = vadd.f32 1.0, %v1682_v18  ;;  %v948_v25 = vmul.f32 -0.5, %v1682_v18  ;;  %v951_v38 = vand.u32 2147483647, %v1682_v18  ;;  %v680_v51 = vor.u32 1.1754944e-38, %v679_v30 }
  0x29   : > { %1687 = vlog2.f32 %v936_v19  ;;  %v940_v26 = vadd.f32 1.0, %v939_v20  ;;  %vm2055_vm7 = vcmp.lt.f32.partialorder %v942_v33, 0.0004427343  ;;  %vm2074_vm11 = vcmp.eq.f32.partialorder %v692_v36, 8.507059e+37  ;;  %v2100_v20 = vld [vmem:[%s2023_s23 + $0x50] sm:$0xff] }
  0x2a   : > { %1689 = vlog2.f32 %v945_v24  ;;  %v949_v34 = vadd.f32 1.0, %v948_v25  ;;  %vm2064_vm9 = vcmp.lt.f32.partialorder %v951_v38, 0.0004427343  ;;  %v695_v59 = vor.u32 1.1754944e-38, %v694_v37 }
  0x2b   : > { %v1684_v28 = vpop.eup %1683  ;;  %1691 = vpow2.f32 %v1599_v21  ;;  %v941_v40 = vmul.f32 %v1680_v16, %v940_v26  ;;  %v1598_v37 = vmul.f32 -1.442695, %v2112_v29 }
  0x2c   : > { %v1686_v31 = vpop.eup %1685  ;;  %v669_v32 = vmul.f32 %v1684_v28, %v456_v13  ;;  %vm674_vm4 = vweird.f32 %v1684_v28  ;;  %1693 = vpow2.f32 %v1600_v27  ;;  %v950_v48 = vmul.f32 %v1682_v18, %v949_v34 }
  0x2d   : > { %v684_v35 = vmul.f32 %v1686_v31, %v457_v14  ;;  %vm689_vm5 = vweird.f32 %v1686_v31  ;;  %vm2060_vm8 = vmor %vm673_vm0, %vm674_vm4 }
  0x2e   : > { %v670_v39 = vsub.f32 1.0, %v669_v32  ;;  %vm2070_vm10 = vmor %vm688_vm1, %vm689_vm5  ;;  %v1597_v32 = vmul.f32 -1.442695, %v2100_v20  ;;  %vm726_vm5 = vcmp.ne.f32.partialorder %v2036_v15, %v2036_v15 }
  0x2f   : > { %v685_v41 = vsub.f32 1.0, %v684_v35  ;;  %v1688_v44 = vpop.eup %1687 }
  0x30   : > { %v671_v45 = vmul.f32 %v1684_v28, %v670_v39  ;;  %v1690_v49 = vpop.eup %1689  ;;  %v938_v53 = vmul.f32 0.6931472, %v1688_v44 }
  0x31   : > { %v686_v52 = vmul.f32 %v1686_v31, %v685_v41  ;;  %v1692_v55 = vpop.eup %1691  ;;  %v947_v60 = vmul.f32 0.6931472, %v1690_v49 }
  0x32   : > { %v672_v56 = vadd.f32 %v1684_v28, %v671_v45  ;;  %v944_v62 = vsel %vm2055_vm7, %v941_v40, %v938_v53  ;;  %v1694_v4 = vpop.eup %1693  ;;  %v2084_v9 = vadd.f32 1.0, %v1692_v55  ;;  %v757_v55 = vand.u32 2147483647, %v2112_v29 }
  0x33   : > { %v687_v61 = vadd.f32 %v1686_v31, %v686_v52  ;;  %v953_v7 = vsel %vm2064_vm9, %v950_v48, %v947_v60  ;;  %v968_v8 = vadd.f32 %v944_v62, %v712_v22  ;;  %v2108_v24 = vadd.f32 1.0, %v1694_v4 }
  0x34   : > { %v676_v6 = vsel %vm2060_vm8, %v1684_v28, %v672_v56  ;;  %v969_v13 = vadd.f32 %v953_v7, %v713_v23  ;;  %1695 = vrcp.f32 %v2084_v9  ;;  %v647_v41 = vand.u32 2147483647, %v2084_v9 }
  0x35   : > { %v681_v11 = vsel %vm2051_vm6, %v680_v51, %v676_v6  ;;  %v691_v12 = vsel %vm2070_vm10, %v1686_v31, %v687_v61  ;;  %v984_v16 = vsel %vm728_vm2, %v2026_v1, %v968_v8  ;;  %v802_v31 = vmul.f32 1.442695, %v774_v63  ;;  %v2143_v8 = vld [vmem:[%s2023_s23 + $0x40] sm:$0xff] }
  0x36   : > { %v696_v14 = vsel %vm2074_vm11, %v695_v59, %v691_v12  ;;  %v1016_v18 = vmul.f32 %v681_v11, %v681_v11  ;;  %v1032_v19 = vsub.f32 1.0, %v681_v11  ;;  %v985_v22 = vsel %vm729_vm3, %v2029_v2, %v969_v13 }
  0x37   : > { %v1017_v23 = vmul.f32 %v696_v14, %v696_v14  ;;  %v1000_v25 = vsub.f32 %v984_v16, %v2026_v1  ;;  %v1033_v26 = vsub.f32 1.0, %v696_v14  ;;  %v1001_v33 = vsub.f32 %v985_v22, %v2029_v2 }
  0x38   : > { %v1048_v27 = vmul.f32 %v1032_v19, %v1032_v19  ;;  %v1096_v28 = vmul.f32 0.75, %v1016_v18  ;;  %1697 = vrcp.f32 %v2108_v24  ;;  %v710_v1 = vmax.f32 %v2036_v15, 0.0 }
  0x39   : > { %v1097_v30 = vmul.f32 0.75, %v1017_v23  ;;  %v1049_v34 = vmul.f32 %v1033_v26, %v1033_v26  ;;  %v649_v42 = vand.u32 2147483648, %v2084_v9  ;;  %1699 = vpow2.f32 %v802_v31 }
  0x3a   : > { %v1064_v35 = vmul.f32 0.25, %v1048_v27  ;;  %v1112_v36 = vmul.f32 %v1096_v28, %v984_v16  ;;  %v756_v2 = vand.u32 2147483647, %v2100_v20  ;;  %1701 = vpow2.f32 %v1597_v32  ;;  %v1696_v47 = vpop.eup %1695 }
  0x3b   : > { %v1065_v38 = vmul.f32 0.25, %v1049_v34  ;;  %v1113_v40 = vmul.f32 %v1097_v30, %v985_v22  ;;  %vm643_vm13 = vweird.f32 %v2084_v9  ;;  %v662_v48 = vand.u32 2147483647, %v2108_v24 }
  0x3c   : > { %v1080_v39 = vmul.f32 %v1064_v35, %v1000_v25  ;;  %v664_v49 = vand.u32 2147483648, %v2108_v24  ;;  %1703 = vpow2.f32 %v804_v43  ;;  %v639_v51 = vmul.f32 %v1696_v47, %v2084_v9 }
  0x3d   : > { %v1081_v44 = vmul.f32 %v1065_v38, %v1001_v33  ;;  %vm2129_vm14 = vcmp.eq.f32.partialorder %v647_v41, 8.507059e+37  ;;  %1705 = vpow2.f32 %v1598_v37  ;;  %v650_v54 = vor.u32 1.1754944e-38, %v649_v42 }
  0x3e   : > { %v1128_v45 = vsub.f32 %v1080_v39, %v1112_v36  ;;  %v1698_v53 = vpop.eup %1697  ;;  %vm658_vm15 = vweird.f32 %v2108_v24  ;;  %v772_v56 = vsub.f32 0.0, %v756_v2  ;;  %v640_v58 = vsub.f32 1.0, %v639_v51 }
  0x3f   : > { %v1129_v50 = vsub.f32 %v1081_v44, %v1113_v40  ;;  %vm644_vm0 = vweird.f32 %v1696_v47  ;;  %v654_v59 = vmul.f32 %v1698_v53, %v2108_v24  ;;  %v1700_v60 = vpop.eup %1699  ;;  %vm659_vm1 = vweird.f32 %v1698_v53 }
  0x40   : > { %vm2136_vm2 = vcmp.eq.f32.partialorder %v662_v48, 8.507059e+37  ;;  %v665_v62 = vor.u32 1.1754944e-38, %v664_v49  ;;  %v708_v63 = vmax.f32 %v2100_v20, 0.0  ;;  %v1702_v3 = vpop.eup %1701  ;;  %v918_v7 = vadd.f32 1.0, %v1700_v60  ;;  %vm2148_vm3 = vmor %vm643_vm13, %vm644_vm0 }
  0x41   : > { %v1138_v57 = vpack.c.bf16 %v1129_v50, %v1128_v45  ;;  %v655_v6 = vsub.f32 1.0, %v654_v59  ;;  %v921_v13 = vmul.f32 -0.5, %v1700_v60  ;;  %v2152_v14 = vadd.f32 1.0, %v1702_v3  ;;  %vm2157_vm4 = vmor %vm658_vm15, %vm659_vm1 }
  0x42   : > { %v1704_v11 = vpop.eup %1703  ;;  %v773_v16 = vsub.f32 0.0, %v757_v55  ;;  %v798_v18 = vmul.f32 1.442695, %v772_v56  ;;  %1707 = vlog2.f32 %v918_v7  ;;  %v924_v26 = vand.u32 2147483647, %v1700_v60 }
  0x43   : > { %v1165_v4 = vsel %vm1139_vm12, %v1138_v57, 0  ;;  %v1706_v19 = vpop.eup %1705  ;;  %v656_v22 = vmul.f32 %v1698_v53, %v655_v6  ;;  %v927_v23 = vadd.f32 1.0, %v1704_v11  ;;  %v922_v9 = vadd.f32 1.0, %v921_v13 }
  0x44   : > { %1167 = vmatpush.bf16.xpose.msra.mxu0 %v1165_v4  ;;  %v930_v27 = vmul.f32 -0.5, %v1704_v11  ;;  %v2164_v28 = vmul.f32 -1.442695, %v2143_v8  ;;  %v933_v32 = vand.u32 2147483647, %v1704_v11  ;;  %vm727_vm6 = vcmp.ne.f32.partialorder %v2039_v17, %v2039_v17 }
  0x45   : > { %v657_v31 = vadd.f32 %v1698_v53, %v656_v22  ;;  %1709 = vlog2.f32 %v927_v23  ;;  %v2172_v34 = vadd.f32 1.0, %v1706_v19  ;;  %v923_v39 = vmul.f32 %v1700_v60, %v922_v9 }
  0x46   : > { %v931_v33 = vadd.f32 1.0, %v930_v27  ;;  %1711 = vpow2.f32 %v798_v18  ;;  %vm2179_vm7 = vcmp.lt.f32.partialorder %v924_v26, 0.0004427343  ;;  %v617_v41 = vand.u32 2147483647, %v2152_v14 }
  0x47   : > { %v661_v35 = vsel %vm2157_vm4, %v1698_v53, %v657_v31  ;;  %1713 = vrcp.f32 %v2152_v14  ;;  %vm2184_vm8 = vcmp.lt.f32.partialorder %v933_v32, 0.0004427343  ;;  %v619_v49 = vand.u32 2147483648, %v2152_v14 }
  0x48   : > { %v666_v38 = vsel %vm2136_vm2, %v665_v62, %v661_v35  ;;  %v1708_v42 = vpop.eup %1707  ;;  %v932_v48 = vmul.f32 %v1704_v11, %v931_v33  ;;  %1715 = vrcp.f32 %v2172_v34  ;;  %vm613_vm9 = vweird.f32 %v2152_v14 }
  0x49   : > { %v1015_v2 = vmul.f32 %v666_v38, %v666_v38  ;;  %v1031_v44 = vsub.f32 1.0, %v666_v38  ;;  %vm2193_vm10 = vcmp.eq.f32.partialorder %v617_v41, 8.507059e+37  ;;  %vm628_vm11 = vweird.f32 %v2172_v34 }
  0x4a   : > { %v620_v61 = vor.u32 1.1754944e-38, %v619_v49  ;;  %v632_v62 = vand.u32 2147483647, %v2172_v34  ;;  %v800_v3 = vmul.f32 1.442695, %v773_v16  ;;  %v634_v7 = vand.u32 2147483648, %v2172_v34 }
  0x4b   : > { %v1710_v50 = vpop.eup %1709  ;;  %v1047_v51 = vmul.f32 %v1031_v44, %v1031_v44  ;;  %v1095_v57 = vmul.f32 0.75, %v1015_v2  ;;  %v1908_v43 = vmov 3   ;;  %v2242_v2 = vld [vmem:[%s2023_s23 + $0x48] sm:$0xff] }
  0x4c   : > { %v929_v56 = vmul.f32 0.6931472, %v1710_v50  ;;  %1717 = vpow2.f32 %v800_v3  ;;  %vm2225_vm0 = vcmp.eq.f32.partialorder %v632_v62, 8.507059e+37  ;;  %1665 = vset.pattern.permute.xlu0 %v1908_v43 }
  0x4e   : > { %v935_v4 = vsel %vm2184_vm8, %v932_v48, %v929_v56  ;;  %v707_v48 = vmax.f32 %v2242_v2, 0.0 }
  0x4f   : > { %v967_v11 = vadd.f32 %v935_v4, %v711_v46 }
  0x8c   : > { %v1186_v5 = vpop.permute.xlu0 %1185 }
  0x8d   : > { %v2087_v10 = vsub.f32 %v2014_v0, %v1186_v5  ;;  %v641_v5 = vmul.f32 %v1696_v47, %v640_v58 }
  0x8f   : > { %1223 = vrot.lane.b32.xlu0 %v2087_v10, %s1906_s29  ;;  %v1324_v21 = vmul.f32 2.5, %v2087_v10  ;;  %s2855_s29 = sshll.u32 %s2737_s14, 3 }
  0x91   : > { %1326 = vrot.lane.b32.xlu1 %v1324_v21, %s1905_s19  ;;  %v642_v21 = vadd.f32 %v1696_v47, %v641_v5  ;;  %v1063_v5 = vmul.f32 0.25, %v1047_v51  ;;  %s356_s19 = scalar_lea.vmem %s2848_s1, %s1582_s16 }
  0x93   : > { %v646_v30 = vsel %vm2148_vm3, %v1696_v47, %v642_v21  ;;  %v920_v47 = vmul.f32 0.6931472, %v1708_v42  ;;  %v983_v21 = vsel %vm727_vm6, %v2039_v17, %v967_v11  ;;  %vm724_vm3 = vcmp.ne.f32.partialorder %v2100_v20, %v2100_v20 }
  0x94   : > { %v651_v24 = vsel %vm2129_vm14, %v650_v54, %v646_v30  ;;  %v1712_v54 = vpop.eup %1711  ;;  %v999_v23 = vsub.f32 %v983_v21, %v2039_v17  ;;  %v1111_v9 = vmul.f32 %v1095_v57, %v983_v21  ;;  %v755_v21 = vand.u32 2147483647, %v2242_v2 }
  0x95   : > { %v1014_v36 = vmul.f32 %v651_v24, %v651_v24  ;;  %v1030_v37 = vsub.f32 1.0, %v651_v24  ;;  %v926_v55 = vsel %vm2179_vm7, %v923_v39, %v920_v47  ;;  %v1714_v59 = vpop.eup %1713  ;;  %v900_v19 = vadd.f32 1.0, %v1712_v54 }
  0x96   : > { %v966_v60 = vadd.f32 %v926_v55, %v710_v1  ;;  %v609_v6 = vmul.f32 %v1714_v59, %v2152_v14  ;;  %vm614_vm13 = vweird.f32 %v1714_v59  ;;  %v1716_v12 = vpop.eup %1715  ;;  %v903_v22 = vmul.f32 -0.5, %v1712_v54 }
  0x97   : > { %v1046_v45 = vmul.f32 %v1030_v37, %v1030_v37  ;;  %v1094_v53 = vmul.f32 0.75, %v1014_v36  ;;  %v624_v46 = vmul.f32 %v1716_v12, %v2172_v34  ;;  %vm629_vm14 = vweird.f32 %v1716_v12  ;;  %vm2221_vm15 = vmor %vm613_vm9, %vm614_vm13  ;;  %v1718_v35 = vpop.eup %1717  ;;  %1205 = vperm.xlu0 %1665, %v2014_v0  }
  0x98   : > { %v982_v1 = vsel %vm726_vm5, %v2036_v15, %v966_v60  ;;  %v610_v18 = vsub.f32 1.0, %v609_v6  ;;  %1719 = vlog2.f32 %v900_v19  ;;  %v904_v30 = vadd.f32 1.0, %v903_v22  ;;  %vm2235_vm1 = vmor %vm628_vm11, %vm629_vm14 }
  0x99   : > { %v1062_v52 = vmul.f32 0.25, %v1046_v45  ;;  %v998_v13 = vsub.f32 %v982_v1, %v2036_v15  ;;  %v1110_v16 = vmul.f32 %v1094_v53, %v982_v1  ;;  %v625_v27 = vsub.f32 1.0, %v624_v46  ;;  %v2273_v46 = vld [vmem:[%s2023_s23 + $0x30] sm:$0xff] }
  0x9a   : > { %v611_v26 = vmul.f32 %v1714_v59, %v610_v18  ;;  %v906_v31 = vand.u32 2147483647, %v1712_v54  ;;  %v1079_v32 = vmul.f32 %v1063_v5, %v999_v23  ;;  %v635_v37 = vor.u32 1.1754944e-38, %v634_v7 }
  0x9b   : > { %v1078_v25 = vmul.f32 %v1062_v52, %v998_v13  ;;  %v626_v17 = vmul.f32 %v1716_v12, %v625_v27  ;;  %v1907_v14 = vmov 1   ;;  %v909_v41 = vadd.f32 1.0, %v1718_v35 }
  0x9c   : > { %v612_v33 = vadd.f32 %v1714_v59, %v611_v26  ;;  %1666 = vset.pattern.permute.xlu1 %v1907_v14  ;;  %v1127_v38 = vsub.f32 %v1079_v32, %v1111_v9  ;;  %v912_v42 = vmul.f32 -0.5, %v1718_v35  ;;  %v905_v47 = vmul.f32 %v1712_v54, %v904_v30 }
  0x9d   : > { %v1126_v24 = vsub.f32 %v1078_v25, %v1110_v16  ;;  %1211 = vperm.xlu1 %1666, %v2014_v0   ;;  %v627_v45 = vadd.f32 %v1716_v12, %v626_v17  ;;  %1721 = vpow2.f32 %v2164_v28  ;;  %vm2248_vm2 = vcmp.lt.f32.partialorder %v906_v31, 0.0004427343 }
  0x9e   : > { %v616_v39 = vsel %vm2221_vm15, %v1714_v59, %v612_v33  ;;  %1723 = vlog2.f32 %v909_v41  ;;  %v913_v49 = vadd.f32 1.0, %v912_v42  ;;  %v1720_v50 = vpop.eup %1719  ;;  %v1596_v55 = vmul.f32 -1.442695, %v2242_v2 }
  0x9f   : > { %v621_v44 = vsel %vm2193_vm10, %v620_v61, %v616_v39  ;;  %v1137_v34 = vpack.c.bf16 %v1127_v38, %v1126_v24  ;;  %v631_v51 = vsel %vm2235_vm1, %v1716_v12, %v627_v45  ;;  %v902_v56 = vmul.f32 0.6931472, %v1720_v50 }
  0xa0   : > { %v1012_v52 = vmul.f32 %v621_v44, %v621_v44  ;;  %v1028_v53 = vsub.f32 1.0, %v621_v44  ;;  %v636_v28 = vsel %vm2225_vm0, %v635_v37, %v631_v51  ;;  %v915_v57 = vand.u32 2147483647, %v1718_v35  ;;  %v2298_v51 = vld [vmem:[%s2023_s23 + $0x20] sm:$0xff] }
  0xa1   : > { %v1162_v54 = vsel %vm1139_vm12, %v1137_v34, 0  ;;  %v1029_v58 = vsub.f32 1.0, %v636_v28  ;;  %v709_v60 = vmax.f32 %v2112_v29, 0.0  ;;  %v908_v61 = vsel %vm2248_vm2, %v905_v47, %v902_v56 }
  0xa2   : > { %1168 = vmatpush.bf16.xpose.msra.mxu0 %v1162_v54  ;;  %v1044_v59 = vmul.f32 %v1028_v53, %v1028_v53  ;;  %1725 = vpow2.f32 %v1596_v55  ;;  %v914_v3 = vmul.f32 %v1718_v35, %v913_v49  ;;  %v964_v4 = vadd.f32 %v908_v61, %v708_v63  ;;  %v2284_v35 = vld [vmem:[%s2023_s23 + $0x38] sm:$0xff] }
  0xa3   : > { %v1722_v62 = vpop.eup %1721  ;;  %v1013_v5 = vmul.f32 %v636_v28, %v636_v28  ;;  %v1092_v6 = vmul.f32 0.75, %v1012_v52  ;;  %vm2265_vm4 = vcmp.lt.f32.partialorder %v915_v57, 0.0004427343  ;;  %v754_v13 = vand.u32 2147483647, %v2143_v8 }
  0xa4   : > { %v1724_v7 = vpop.eup %1723  ;;  %v1060_v1 = vmul.f32 0.25, %v1044_v59  ;;  %v450_v12 = vadd.f32 1.0, %v1722_v62  ;;  %v980_v18 = vsel %vm724_vm3, %v2100_v20, %v964_v4  ;;  %v1045_v19 = vmul.f32 %v1029_v58, %v1029_v58 }
  0xa5   : > { %v911_v16 = vmul.f32 0.6931472, %v1724_v7  ;;  %vm725_vm5 = vcmp.ne.f32.partialorder %v2112_v29, %v2112_v29  ;;  %v996_v63 = vsub.f32 %v980_v18, %v2100_v20  ;;  %v1093_v23 = vmul.f32 0.75, %v1013_v5 }
  0xa6   : > { %1727 = vrcp.f32 %v450_v12  ;;  %v1108_v25 = vmul.f32 %v1092_v6, %v980_v18  ;;  %v770_v9 = vsub.f32 0.0, %v754_v13  ;;  %v771_v30 = vsub.f32 0.0, %v755_v21 }
  0xa7   : > { %v917_v22 = vsel %vm2265_vm4, %v914_v3, %v911_v16  ;;  %v1076_v27 = vmul.f32 %v1060_v1, %v996_v63  ;;  %v1593_v31 = vmul.f32 -1.442695, %v2273_v46  ;;  %v1061_v32 = vmul.f32 0.25, %v1045_v19  ;;  %v2324_v19 = vld [vmem:[%s2023_s23 + $0x28] sm:$0xff] }
  0xa8   : > { %v1726_v26 = vpop.eup %1725  ;;  %v965_v15 = vadd.f32 %v917_v22, %v709_v60  ;;  %v794_v33 = vmul.f32 1.442695, %v770_v9  ;;  %v587_v17 = vand.u32 2147483647, %v450_v12  ;;  %v796_v36 = vmul.f32 1.442695, %v771_v30 }
  0xa9   : > { %v2281_v24 = vadd.f32 1.0, %v1726_v26  ;;  %1729 = vpow2.f32 %v1593_v31  ;;  %v589_v39 = vand.u32 2147483648, %v450_v12  ;;  %v1124_v41 = vsub.f32 %v1076_v27, %v1108_v25 }
  0xaa   : > { %v981_v20 = vsel %vm725_vm5, %v2112_v29, %v965_v15  ;;  %v1594_v44 = vmul.f32 -1.442695, %v2284_v35  ;;  %vm583_vm6 = vweird.f32 %v450_v12  ;;  %vm2300_vm8 = vcmp.eq.f32.partialorder %v587_v17, 8.507059e+37  ;;  %v2442_v15 = vld [vmem:[%s2023_s23 + $0x10] sm:$0xff] }
  0xab   : > { %v997_v37 = vsub.f32 %v981_v20, %v2112_v29  ;;  %v1109_v38 = vmul.f32 %v1093_v23, %v981_v20  ;;  %1731 = vrcp.f32 %v2281_v24  ;;  %v602_v42 = vand.u32 2147483647, %v2281_v24 }
  0xac   : > { %v1728_v40 = vpop.eup %1727  ;;  %1733 = vpow2.f32 %v794_v33  ;;  %v604_v34 = vand.u32 2147483648, %v2281_v24  ;;  %v706_v29 = vmax.f32 %v2143_v8, 0.0  ;;  %v590_v55 = vor.u32 1.1754944e-38, %v589_v39 }
  0xad   : > { %v1077_v45 = vmul.f32 %v1061_v32, %v997_v37  ;;  %v579_v47 = vmul.f32 %v1728_v40, %v450_v12  ;;  %1735 = vpow2.f32 %v796_v36  ;;  %vm584_vm7 = vweird.f32 %v1728_v40 }
  0xae   : > { %1737 = vpow2.f32 %v1594_v44  ;;  %vm598_vm9 = vweird.f32 %v2281_v24  ;;  %vm2305_vm10 = vcmp.eq.f32.partialorder %v602_v42, 8.507059e+37  ;;  %v605_v58 = vor.u32 1.1754944e-38, %v604_v34  ;;  %vm2311_vm11 = vmor %vm583_vm6, %vm584_vm7 }
  0xaf   : > { %v1125_v49 = vsub.f32 %v1077_v45, %v1109_v38  ;;  %v580_v50 = vsub.f32 1.0, %v579_v47  ;;  %v1730_v52 = vpop.eup %1729  ;;  %v752_v59 = vand.u32 2147483647, %v2273_v46  ;;  %v753_v4 = vand.u32 2147483647, %v2284_v35 }
  0xb0   : > { %v2316_v3 = vadd.f32 1.0, %v1730_v52  ;;  %v2320_v5 = vmul.f32 -1.442695, %v2298_v51  ;;  %vm722_vm14 = vcmp.ne.f32.partialorder %v2143_v8, %v2143_v8  ;;  %vm723_vm0 = vcmp.ne.f32.partialorder %v2242_v2, %v2242_v2 }
  0xb1   : > { %v1732_v28 = vpop.eup %1731  ;;  %v1136_v56 = vpack.c.bf16 %v1125_v49, %v1124_v41  ;;  %v581_v57 = vmul.f32 %v1728_v40, %v580_v50  ;;  %v768_v31 = vsub.f32 0.0, %v752_v59  ;;  %v2341_v32 = vmul.f32 -1.442695, %v2324_v19 }
  0xb2   : > { %v1734_v60 = vpop.eup %1733  ;;  %v594_v62 = vmul.f32 %v1732_v28, %v2281_v24  ;;  %vm599_vm13 = vweird.f32 %v1732_v28  ;;  %v557_v37 = vand.u32 2147483647, %v2316_v3  ;;  %v769_v38 = vsub.f32 0.0, %v753_v4 }
  0xb3   : > { %v1736_v6 = vpop.eup %1735  ;;  %v1159_v7 = vsel %vm1139_vm12, %v1136_v56, 0  ;;  %v582_v11 = vadd.f32 %v1728_v40, %v581_v57  ;;  %v882_v1 = vadd.f32 1.0, %v1734_v60  ;;  %v885_v12 = vmul.f32 -0.5, %v1734_v60  ;;  %vm2334_vm15 = vmor %vm598_vm9, %vm599_vm13 }
  0xb4   : > { %1169 = vmatpush.bf16.xpose.msra.mxu0 %v1159_v7  ;;  %v595_v13 = vsub.f32 1.0, %v594_v62  ;;  %v891_v16 = vadd.f32 1.0, %v1736_v6  ;;  %v894_v18 = vmul.f32 -0.5, %v1736_v6  ;;  %v1738_v21 = vpop.eup %1737  ;;  %v888_v23 = vand.u32 2147483647, %v1734_v60 }
  0xb5   : > { %v586_v63 = vsel %vm2311_vm11, %v1728_v40, %v582_v11  ;;  %1739 = vlog2.f32 %v882_v1  ;;  %v886_v22 = vadd.f32 1.0, %v885_v12  ;;  %v897_v26 = vand.u32 2147483647, %v1736_v6 }
  0xb6   : > { %v591_v25 = vsel %vm2300_vm8, %v590_v55, %v586_v63  ;;  %v596_v9 = vmul.f32 %v1732_v28, %v595_v13  ;;  %1741 = vlog2.f32 %v891_v16  ;;  %v895_v27 = vadd.f32 1.0, %v894_v18 }
  0xb7   : > { %v1010_v30 = vmul.f32 %v591_v25, %v591_v25  ;;  %v1026_v20 = vsub.f32 1.0, %v591_v25  ;;  %v2343_v17 = vadd.f32 1.0, %v1738_v21  ;;  %1743 = vrcp.f32 %v2316_v3 }
  0xb8   : > { %v597_v33 = vadd.f32 %v1732_v28, %v596_v9  ;;  %v887_v24 = vmul.f32 %v1734_v60, %v886_v22  ;;  %vm2346_vm1 = vcmp.lt.f32.partialorder %v888_v23, 0.0004427343  ;;  %vm2353_vm2 = vcmp.lt.f32.partialorder %v897_v26, 0.0004427343 }
  0xb9   : > { %v1042_v41 = vmul.f32 %v1026_v20, %v1026_v20  ;;  %1745 = vrcp.f32 %v2343_v17  ;;  %v896_v45 = vmul.f32 %v1736_v6, %v895_v27  ;;  %v1090_v47 = vmul.f32 0.75, %v1010_v30 }
  0xba   : > { %v601_v39 = vsel %vm2334_vm15, %v1732_v28, %v597_v33  ;;  %vm553_vm3 = vweird.f32 %v2316_v3  ;;  %v559_v53 = vand.u32 2147483648, %v2316_v3  ;;  %vm2362_vm4 = vcmp.eq.f32.partialorder %v557_v37, 8.507059e+37 }
  0xbb   : > { %v1740_v42 = vpop.eup %1739  ;;  %v606_v44 = vsel %vm2305_vm10, %v605_v58, %v601_v39  ;;  %v1058_v28 = vmul.f32 0.25, %v1042_v41  ;;  %vm568_vm5 = vweird.f32 %v2343_v17  ;;  %v572_v54 = vand.u32 2147483647, %v2343_v17 }
  0xbc   : > { %v1742_v34 = vpop.eup %1741  ;;  %v884_v49 = vmul.f32 0.6931472, %v1740_v42  ;;  %v1011_v50 = vmul.f32 %v606_v44, %v606_v44  ;;  %v1027_v52 = vsub.f32 1.0, %v606_v44  ;;  %v574_v60 = vand.u32 2147483648, %v2343_v17 }
  0xbd   : > { %v893_v55 = vmul.f32 0.6931472, %v1742_v34  ;;  %v1744_v57 = vpop.eup %1743  ;;  %v790_v61 = vmul.f32 1.442695, %v768_v31  ;;  %v792_v63 = vmul.f32 1.442695, %v769_v38  ;;  %vm720_vm13 = vcmp.ne.f32.partialorder %v2273_v46, %v2273_v46 }
  0xbe   : > { %v890_v58 = vsel %vm2346_vm1, %v887_v24, %v884_v49  ;;  %v1043_v59 = vmul.f32 %v1027_v52, %v1027_v52  ;;  %v1091_v6 = vmul.f32 0.75, %v1011_v50  ;;  %v549_v7 = vmul.f32 %v1744_v57, %v2316_v3 }
  0xbf   : > { %v899_v62 = vsel %vm2353_vm2, %v896_v45, %v893_v55  ;;  %v962_v4 = vadd.f32 %v890_v58, %v706_v29  ;;  %v1746_v11 = vpop.eup %1745  ;;  %vm554_vm6 = vweird.f32 %v1744_v57  ;;  %1747 = vpow2.f32 %v790_v61 }
  0xc0   : > { %v963_v1 = vadd.f32 %v899_v62, %v707_v48  ;;  %v1059_v12 = vmul.f32 0.25, %v1043_v59  ;;  %v550_v16 = vsub.f32 1.0, %v549_v7  ;;  %v564_v18 = vmul.f32 %v1746_v11, %v2343_v17  ;;  %vm2392_vm8 = vmor %vm553_vm3, %vm554_vm6 }
  0xc1   : > { %v978_v13 = vsel %vm722_vm14, %v2143_v8, %v962_v4  ;;  %vm569_vm7 = vweird.f32 %v1746_v11  ;;  %v560_v27 = vor.u32 1.1754944e-38, %v559_v53  ;;  %1749 = vpow2.f32 %v792_v63 }
  0xc2   : > { %v979_v29 = vsel %vm723_vm0, %v2242_v2, %v963_v1  ;;  %v994_v21 = vsub.f32 %v978_v13, %v2143_v8  ;;  %v1106_v48 = vmul.f32 %v1090_v47, %v978_v13  ;;  %v551_v25 = vmul.f32 %v1744_v57, %v550_v16  ;;  %vm2402_vm9 = vmor %vm568_vm5, %vm569_vm7 }
  0xc3   : > { %v995_v22 = vsub.f32 %v979_v29, %v2242_v2  ;;  %v1107_v23 = vmul.f32 %v1091_v6, %v979_v29  ;;  %v565_v9 = vsub.f32 1.0, %v564_v18  ;;  %v1909_v33 = vmov 2  }
  0xc4   : > { %v1074_v26 = vmul.f32 %v1058_v28, %v994_v21  ;;  %v552_v31 = vadd.f32 %v1744_v57, %v551_v25  ;;  %1663 = vset.pattern.permute.xlu2 %v1909_v33  ;;  %1751 = vpow2.f32 %v2320_v5  ;;  %1670 = vset.pattern.permute.xlu0 %v1909_v33  ;;  %vm573_vm10 = vcmp.eq.f32.partialorder %v572_v54, 8.507059e+37 }
  0xc5   : > { %v1075_v30 = vmul.f32 %v1059_v12, %v995_v22  ;;  %v566_v8 = vmul.f32 %v1746_v11, %v565_v9  ;;  %v1748_v2 = vpop.eup %1747  ;;  %v575_v24 = vor.u32 1.1754944e-38, %v574_v60  ;;  %1191 = vperm.xlu2 %1663, %v2014_v0   ;;  %1753 = vpow2.f32 %v2341_v32 }
  0xc6   : > { %v1122_v20 = vsub.f32 %v1074_v26, %v1106_v48  ;;  %v556_v5 = vsel %vm2392_vm8, %v1744_v57, %v552_v31  ;;  %v864_v38 = vadd.f32 1.0, %v1748_v2  ;;  %v867_v17 = vmul.f32 -0.5, %v1748_v2 }
  0xc7   : > { %v1123_v36 = vsub.f32 %v1075_v30, %v1107_v23  ;;  %v567_v37 = vadd.f32 %v1746_v11, %v566_v8  ;;  %v561_v39 = vsel %vm2362_vm4, %v560_v27, %v556_v5  ;;  %v870_v42 = vand.u32 2147483647, %v1748_v2  ;;  %v1750_v44 = vpop.eup %1749  ;;  %v2447_v8 = vld [vmem:[%s2023_s23 + $0x18] sm:$0xff] }
  0xc8   : > { %1755 = vlog2.f32 %v864_v38  ;;  %v868_v45 = vadd.f32 1.0, %v867_v17  ;;  %v1024_v32 = vsub.f32 1.0, %v561_v39  ;;  %v704_v49 = vmax.f32 %v2273_v46, 0.0 }
  0xc9   : > { %v1135_v40 = vpack.c.bf16 %v1123_v36, %v1122_v20  ;;  %v571_v41 = vsel %vm2402_vm9, %v1746_v11, %v567_v37  ;;  %v873_v50 = vadd.f32 1.0, %v1750_v44  ;;  %v876_v52 = vmul.f32 -0.5, %v1750_v44 }
  0xca   : > { %v576_v0 = vsel %vm573_vm10, %v575_v24, %v571_v41  ;;  %v1752_v47 = vpop.eup %1751  ;;  %v705_v55 = vmax.f32 %v2284_v35, 0.0  ;;  %v879_v28 = vand.u32 2147483647, %v1750_v44  ;;  %v1008_v56 = vmul.f32 %v561_v39, %v561_v39 }
  0xcb   : > { %v1156_v34 = vsel %vm1139_vm12, %v1135_v40, 0  ;;  %v1754_v53 = vpop.eup %1753  ;;  %v1025_v54 = vsub.f32 1.0, %v576_v0  ;;  %vm2417_vm11 = vcmp.lt.f32.partialorder %v870_v42, 0.0004427343  ;;  %1757 = vlog2.f32 %v873_v50  ;;  %v2470_v50 = vld [vmem:[%s2011_s17] sm:$0xff]  ;;  %s347_s17 = scalar_lea.vmem [#allocation4], %s2855_s29 }
  0xcc   : > { %1170 = vmatpush.bf16.xpose.msra.mxu0 %v1156_v34  ;;  %v1009_v58 = vmul.f32 %v576_v0, %v576_v0  ;;  %v1040_v59 = vmul.f32 %v1024_v32, %v1024_v32  ;;  %v869_v60 = vmul.f32 %v1748_v2, %v868_v45  ;;  %v877_v61 = vadd.f32 1.0, %v876_v52  ;;  %s1419_s18 = sshll.u32 %s347_s17, 4  ;;  %s1420_s18 = int_to_ptr.vmem [resolvable:$true] %s1419_s18 }
  0xcd   : > { %v1041_v62 = vmul.f32 %v1025_v54, %v1025_v54  ;;  %v2421_v4 = vadd.f32 1.0, %v1752_v47  ;;  %v2425_v7 = vadd.f32 1.0, %v1754_v53  ;;  %v750_v11 = vand.u32 2147483647, %v2298_v51  ;;  %v2532_v53 = vld [vmem:[%s2023_s23] sm:$0xff] }
  0xce   : > { %v1756_v6 = vpop.eup %1755  ;;  %v751_v1 = vand.u32 2147483647, %v2324_v19  ;;  %vm721_vm14 = vcmp.ne.f32.partialorder %v2284_v35, %v2284_v35  ;;  %vm2431_vm15 = vcmp.lt.f32.partialorder %v879_v28, 0.0004427343  ;;  %v1056_v16 = vmul.f32 0.25, %v1040_v59 }
  0xcf   : > { %v866_v12 = vmul.f32 0.6931472, %v1756_v6  ;;  %1759 = vrcp.f32 %v2421_v4  ;;  %v1088_v18 = vmul.f32 0.75, %v1008_v56  ;;  %v1089_v29 = vmul.f32 0.75, %v1009_v58 }
  0xd0   : > { %1761 = vrcp.f32 %v2425_v7  ;;  %v878_v48 = vmul.f32 %v1750_v44, %v877_v61  ;;  %v1057_v63 = vmul.f32 0.25, %v1041_v62  ;;  %v766_v22 = vsub.f32 0.0, %v750_v11 }
  0xd1   : > { %v872_v21 = vsel %vm2417_vm11, %v869_v60, %v866_v12  ;;  %v1758_v23 = vpop.eup %1757  ;;  %vm523_vm0 = vweird.f32 %v2421_v4  ;;  %v527_v9 = vand.u32 2147483647, %v2421_v4  ;;  %v767_v26 = vsub.f32 0.0, %v751_v1 }
  0xd2   : > { %v960_v25 = vadd.f32 %v872_v21, %v704_v49  ;;  %v875_v27 = vmul.f32 0.6931472, %v1758_v23  ;;  %v529_v30 = vand.u32 2147483648, %v2421_v4  ;;  %vm538_vm1 = vweird.f32 %v2425_v7 }
  0xd3   : > { %v786_v31 = vmul.f32 1.442695, %v766_v22  ;;  %v542_v20 = vand.u32 2147483647, %v2425_v7  ;;  %v544_v3 = vand.u32 2147483648, %v2425_v7  ;;  %v1910_v32 = vmov 0  }
  0xd4   : > { %v976_v2 = vsel %vm720_vm13, %v2273_v46, %v960_v25  ;;  %v788_v24 = vmul.f32 1.442695, %v767_v26  ;;  %v881_v5 = vsel %vm2431_vm15, %v878_v48, %v875_v27  ;;  %v1589_v38 = vmul.f32 -1.442695, %v2442_v15  ;;  %1664 = vset.pattern.permute.xlu2 %v1910_v32  ;;  %1667 = vset.pattern.permute.xlu1 %v1910_v32 }
  0xd5   : > { %v1760_v36 = vpop.eup %1759  ;;  %v992_v37 = vsub.f32 %v976_v2, %v2273_v46  ;;  %1763 = vpow2.f32 %v786_v31  ;;  %v961_v17 = vadd.f32 %v881_v5, %v705_v55  ;;  %v1590_v41 = vmul.f32 -1.442695, %v2447_v8  ;;  %1197 = vperm.xlu2 %1664, %v2470_v50  }
  0xd6   : > { %v1762_v39 = vpop.eup %1761  ;;  %v519_v40 = vmul.f32 %v1760_v36, %v2421_v4  ;;  %1765 = vpow2.f32 %v788_v24  ;;  %v1104_v44 = vmul.f32 %v1088_v18, %v976_v2  ;;  %vm524_vm2 = vweird.f32 %v1760_v36 }
  0xd7   : > { %v1072_v42 = vmul.f32 %v1056_v16, %v992_v37  ;;  %v534_v0 = vmul.f32 %v1762_v39, %v2425_v7  ;;  %v977_v46 = vsel %vm721_vm14, %v2284_v35, %v961_v17  ;;  %vm539_vm3 = vweird.f32 %v1762_v39  ;;  %vm2480_vm5 = vmor %vm523_vm0, %vm524_vm2 }
  0xd8   : > { %v520_v45 = vsub.f32 1.0, %v519_v40  ;;  %v993_v47 = vsub.f32 %v977_v46, %v2284_v35  ;;  %v1105_v34 = vmul.f32 %v1089_v29, %v977_v46  ;;  %1767 = vpow2.f32 %v1589_v38  ;;  %vm2491_vm7 = vmor %vm538_vm1, %vm539_vm3 }
  0xd9   : > { %v535_v49 = vsub.f32 1.0, %v534_v0  ;;  %vm2473_vm4 = vcmp.eq.f32.partialorder %v527_v9, 8.507059e+37  ;;  %v530_v55 = vor.u32 1.1754944e-38, %v529_v30  ;;  %1769 = vpow2.f32 %v1590_v41 }
  0xda   : > { %v521_v52 = vmul.f32 %v1760_v36, %v520_v45  ;;  %v1073_v56 = vmul.f32 %v1057_v63, %v993_v47  ;;  %v1120_v54 = vsub.f32 %v1072_v42, %v1104_v44  ;;  %vm2484_vm6 = vcmp.eq.f32.partialorder %v542_v20, 8.507059e+37  ;;  %v1311_v42 = vpop.permute.xlu1 %1310 }
  0xdb   : > { %v1764_v28 = vpop.eup %1763  ;;  %v536_v57 = vmul.f32 %v1762_v39, %v535_v49  ;;  %v545_v62 = vor.u32 1.1754944e-38, %v544_v3  ;;  %v702_v18 = vmax.f32 %v2298_v51, 0.0  ;;  %v703_v25 = vmax.f32 %v2324_v19, 0.0 }
  0xdc   : > { %v1766_v59 = vpop.eup %1765  ;;  %v522_v60 = vadd.f32 %v1760_v36, %v521_v52  ;;  %v846_v4 = vadd.f32 1.0, %v1764_v28  ;;  %v849_v6 = vmul.f32 -0.5, %v1764_v28  ;;  %v1121_v11 = vsub.f32 %v1073_v56, %v1105_v34 }
  0xdd   : > { %v537_v1 = vadd.f32 %v1762_v39, %v536_v57  ;;  %v855_v12 = vadd.f32 1.0, %v1766_v59  ;;  %v858_v13 = vmul.f32 -0.5, %v1766_v59  ;;  %v852_v9 = vand.u32 2147483647, %v1764_v28  ;;  %1668 = vset.pattern.permute.xlu2 %v1909_v33 }
  0xde   : > { %v526_v16 = vsel %vm2480_vm5, %v1760_v36, %v522_v60  ;;  %1771 = vlog2.f32 %v846_v4  ;;  %v850_v29 = vadd.f32 1.0, %v849_v6  ;;  %v1768_v21 = vpop.eup %1767  ;;  %v1134_v7 = vpack.c.bf16 %v1121_v11, %v1120_v54 }
  0xdf   : > { %v531_v48 = vsel %vm2473_vm4, %v530_v55, %v526_v16  ;;  %v541_v63 = vsel %vm2491_vm7, %v1762_v39, %v537_v1  ;;  %1773 = vlog2.f32 %v855_v12  ;;  %v1770_v22 = vpop.eup %1769  ;;  %v859_v26 = vadd.f32 1.0, %v858_v13 }
  0xe0   : > { %v546_v23 = vsel %vm2484_vm6, %v545_v62, %v541_v63  ;;  %v1153_v27 = vsel %vm1139_vm12, %v1134_v7, 0  ;;  %vm718_vm8 = vcmp.ne.f32.partialorder %v2298_v51, %v2298_v51  ;;  %v861_v30 = vand.u32 2147483647, %v1766_v59 }
  0xe1   : > { %v1022_v31 = vsub.f32 1.0, %v531_v48  ;;  %1171 = vmatpush.bf16.xpose.msra.mxu0 %v1153_v27  ;;  %v1006_v2 = vmul.f32 %v531_v48, %v531_v48  ;;  %v1007_v20 = vmul.f32 %v546_v23, %v546_v23  ;;  %v1023_v3 = vsub.f32 1.0, %v546_v23 }
  0xe2   : > { %v2509_v24 = vadd.f32 1.0, %v1768_v21  ;;  %vm719_vm9 = vcmp.ne.f32.partialorder %v2324_v19, %v2324_v19  ;;  %v851_v36 = vmul.f32 %v1764_v28, %v850_v29  ;;  %v2513_v37 = vadd.f32 1.0, %v1770_v22 }
  0xe3   : > { %v1038_v5 = vmul.f32 %v1022_v31, %v1022_v31  ;;  %vm2515_vm10 = vcmp.lt.f32.partialorder %v852_v9, 0.0004427343  ;;  %v860_v17 = vmul.f32 %v1766_v59, %v859_v26  ;;  %v748_v33 = vand.u32 2147483647, %v2442_v15  ;;  %v2540_v59 = vld [vmem:[%s2023_s23 + $0x8] sm:$0xff]  ;;  %s2856_s23 = sshll.u32 %s1973_s28, 3 }
  0xe4   : > { %v1772_v38 = vpop.eup %1771  ;;  %1775 = vrcp.f32 %v2509_v24  ;;  %vm2521_vm11 = vcmp.lt.f32.partialorder %v861_v30, 0.0004427343  ;;  %v1039_v44 = vmul.f32 %v1023_v3, %v1023_v3  ;;  %v1086_v46 = vmul.f32 0.75, %v1006_v2 }
  0xe5   : > { %v1774_v40 = vpop.eup %1773  ;;  %v848_v41 = vmul.f32 0.6931472, %v1772_v38  ;;  %1777 = vrcp.f32 %v2513_v37  ;;  %v1087_v45 = vmul.f32 0.75, %v1007_v20  ;;  %vm493_vm13 = vweird.f32 %v2509_v24 }
  0xe6   : > { %v857_v0 = vmul.f32 0.6931472, %v1774_v40  ;;  %v1054_v34 = vmul.f32 0.25, %v1038_v5  ;;  %v497_v49 = vand.u32 2147483647, %v2509_v24  ;;  %v499_v52 = vand.u32 2147483648, %v2509_v24 }
  0xe7   : > { %v854_v47 = vsel %vm2515_vm10, %v851_v36, %v848_v41  ;;  %v749_v56 = vand.u32 2147483647, %v2447_v8  ;;  %v764_v54 = vsub.f32 0.0, %v748_v33  ;;  %v1055_v57 = vmul.f32 0.25, %v1039_v44 }
  0xe8   : > { %v863_v55 = vsel %vm2521_vm11, %v860_v17, %v857_v0  ;;  %v958_v28 = vadd.f32 %v854_v47, %v702_v18  ;;  %vm508_vm14 = vweird.f32 %v2513_v37  ;;  %v514_v58 = vand.u32 2147483648, %v2513_v37 }
  0xe9   : > { %v959_v35 = vadd.f32 %v863_v55, %v703_v25  ;;  %v765_v62 = vsub.f32 0.0, %v749_v56  ;;  %v782_v4 = vmul.f32 1.442695, %v764_v54  ;;  %v1587_v6 = vmul.f32 -1.442695, %v2532_v53 }
  0xea   : > { %v1776_v60 = vpop.eup %1775  ;;  %v974_v61 = vsel %vm718_vm8, %v2298_v51, %v958_v28  ;;  %v1588_v7 = vmul.f32 -1.442695, %v2540_v59  ;;  %v512_v26 = vand.u32 2147483647, %v2513_v37  ;;  %v500_v30 = vor.u32 1.1754944e-38, %v499_v52 }
  0xeb   : > { %v1778_v11 = vpop.eup %1777  ;;  %v975_v1 = vsel %vm719_vm9, %v2324_v19, %v959_v35  ;;  %v990_v12 = vsub.f32 %v974_v61, %v2298_v51  ;;  %v1102_v13 = vmul.f32 %v1086_v46, %v974_v61  ;;  %v489_v16 = vmul.f32 %v1776_v60, %v2509_v24 }
  0xec   : > { %v991_v18 = vsub.f32 %v975_v1, %v2324_v19  ;;  %v1103_v29 = vmul.f32 %v1087_v45, %v975_v1  ;;  %v504_v21 = vmul.f32 %v1778_v11, %v2513_v37  ;;  %vm494_vm15 = vweird.f32 %v1776_v60 }
  0xed   : > { %v1070_v48 = vmul.f32 %v1054_v34, %v990_v12  ;;  %v490_v63 = vsub.f32 1.0, %v489_v16  ;;  %1779 = vpow2.f32 %v782_v4  ;;  %vm509_vm0 = vweird.f32 %v1778_v11  ;;  %vm2559_vm1 = vmor %vm493_vm13, %vm494_vm15 }
  0xee   : > { %v1071_v22 = vmul.f32 %v1055_v57, %v991_v18  ;;  %v505_v23 = vsub.f32 1.0, %v504_v21  ;;  %v784_v25 = vmul.f32 1.442695, %v765_v62  ;;  %vm498_vm2 = vcmp.eq.f32.partialorder %v497_v49, 8.507059e+37  ;;  %vm2565_vm3 = vmor %vm508_vm14, %vm509_vm0 }
  0xef   : > { %v1118_v9 = vsub.f32 %v1070_v48, %v1102_v13  ;;  %v491_v51 = vmul.f32 %v1776_v60, %v490_v63  ;;  %v515_v5 = vor.u32 1.1754944e-38, %v514_v58  ;;  %vm513_vm4 = vcmp.eq.f32.partialorder %v512_v26, 8.507059e+37 }
  0xf0   : > { %v1119_v27 = vsub.f32 %v1071_v22, %v1103_v29  ;;  %v506_v31 = vmul.f32 %v1778_v11, %v505_v23  ;;  %1781 = vpow2.f32 %v784_v25  ;;  %v700_v40 = vmax.f32 %v2442_v15, 0.0 }
  0xf1   : > { %v492_v2 = vadd.f32 %v1776_v60, %v491_v51  ;;  %1783 = vpow2.f32 %v1587_v6  ;;  %v746_v45 = vand.u32 2147483647, %v2532_v53  ;;  %v747_v55 = vand.u32 2147483647, %v2540_v59 }
  0xf2   : > { %v1133_v3 = vpack.c.bf16 %v1119_v27, %v1118_v9  ;;  %v507_v36 = vadd.f32 %v1778_v11, %v506_v31  ;;  %1785 = vpow2.f32 %v1588_v7  ;;  %v701_v56 = vmax.f32 %v2447_v8, 0.0 }
  0xf3   : > { %v1780_v24 = vpop.eup %1779  ;;  %v496_v38 = vsel %vm2559_vm1, %v1776_v60, %v492_v2  ;;  %vm716_vm5 = vcmp.ne.f32.partialorder %v2442_v15, %v2442_v15  ;;  %v1313_v35 = vadd.f32 %v2470_v50, %v1311_v42  ;;  %v762_v12 = vsub.f32 0.0, %v746_v45  ;;  %v2607_v2 = vld [vmem:[%s368_s15] sm:$0xff]  ;;  %s1417_s15 = scalar_lea.hbm %s2854_s7, %s2856_s23 }
  0xf4   : > { %v1150_v39 = vsel %vm1139_vm12, %v1133_v3, 0  ;;  %v501_v17 = vsel %vm498_vm2, %v500_v30, %v496_v38  ;;  %v511_v37 = vsel %vm2565_vm3, %v1778_v11, %v507_v36  ;;  %v828_v33 = vadd.f32 1.0, %v1780_v24  ;;  %1292 = vperm.xlu0 %1670, %v2607_v2   ;;  %1277 = vperm.xlu1 %1667, %v2607_v2  }
  0xf5   : > { %1172 = vmatpush.bf16.xpose.msra.mxu0 %v1150_v39  ;;  %v831_v41 = vmul.f32 -0.5, %v1780_v24  ;;  %v516_v0 = vsel %vm513_vm4, %v515_v5, %v511_v37  ;;  %v1020_v46 = vsub.f32 1.0, %v501_v17  ;;  %v834_v54 = vand.u32 2147483647, %v1780_v24 }
  0xf6   : > { %v1782_v44 = vpop.eup %1781  ;;  %1787 = vlog2.f32 %v828_v33  ;;  %v1004_v57 = vmul.f32 %v501_v17, %v501_v17  ;;  %v1005_v58 = vmul.f32 %v516_v0, %v516_v0  ;;  %v1021_v60 = vsub.f32 1.0, %v516_v0 }
  0xf7   : > { %v1784_v47 = vpop.eup %1783  ;;  %v832_v34 = vadd.f32 1.0, %v831_v41  ;;  %v837_v49 = vadd.f32 1.0, %v1782_v44  ;;  %v840_v52 = vmul.f32 -0.5, %v1782_v44  ;;  %v843_v62 = vand.u32 2147483647, %v1782_v44 }
  0xf8   : > { %v1786_v28 = vpop.eup %1785  ;;  %v1036_v4 = vmul.f32 %v1020_v46, %v1020_v46  ;;  %v2581_v6 = vadd.f32 1.0, %v1784_v47  ;;  %v763_v13 = vsub.f32 0.0, %v747_v55  ;;  %vm717_vm6 = vcmp.ne.f32.partialorder %v2447_v8, %v2447_v8 }
  0xf9   : > { %1789 = vlog2.f32 %v837_v49  ;;  %v841_v61 = vadd.f32 1.0, %v840_v52  ;;  %v833_v11 = vmul.f32 %v1780_v24, %v832_v34  ;;  %v2583_v1 = vadd.f32 1.0, %v1786_v28 }
  0xfa   : > { %vm2587_vm7 = vcmp.lt.f32.partialorder %v834_v54, 0.0004427343  ;;  %v2591_v18 = vmul.f32 0.5, %v1313_v35  ;;  %1791 = vrcp.f32 %v2581_v6  ;;  %v1037_v21 = vmul.f32 %v1021_v60, %v1021_v60 }
  0xfb   : > { %v1084_v7 = vmul.f32 0.75, %v1004_v57  ;;  %1793 = vrcp.f32 %v2583_v1  ;;  %v842_v48 = vmul.f32 %v1782_v44, %v841_v61  ;;  %vm2599_vm8 = vcmp.lt.f32.partialorder %v843_v62, 0.0004427343 }
  0xfc   : > { %v1788_v16 = vpop.eup %1787  ;;  %v1085_v22 = vmul.f32 0.75, %v1005_v58  ;;  %v778_v23 = vmul.f32 1.442695, %v762_v12  ;;  %v1052_v51 = vmul.f32 0.25, %v1036_v4  ;;  %v467_v26 = vand.u32 2147483647, %v2581_v6  ;;  %1674 = vset.pattern.permute.xlu0 %v1907_v14 }
  0xfd   : > { %v830_v29 = vmul.f32 0.6931472, %v1788_v16  ;;  %v780_v27 = vmul.f32 1.442695, %v763_v13  ;;  %v469_v31 = vand.u32 2147483648, %v2581_v6  ;;  %v1053_v3 = vmul.f32 0.25, %v1037_v21 }
  0xfe   : > { %1795 = vpow2.f32 %v778_v23  ;;  %vm463_vm9 = vweird.f32 %v2581_v6  ;;  %vm478_vm10 = vweird.f32 %v2583_v1  ;;  %v482_v39 = vand.u32 2147483647, %v2583_v1 }
  0xff   : > { %v1790_v25 = vpop.eup %1789  ;;  %v836_v9 = vsel %vm2587_vm7, %v833_v11, %v830_v29  ;;  %1797 = vpow2.f32 %v780_v27  ;;  %vm2624_vm11 = vcmp.eq.f32.partialorder %v467_v26, 8.507059e+37  ;;  %v470_v44 = vor.u32 1.1754944e-38, %v469_v31  ;;  %v2664_v26 = vld [vmem:[%s356_s19] sm:$0xf]  ;;  %s1421_s19 = sshll.u32 %s1417_s15, 4  ;;  %s1828_s15 = scalar_lea.hbm %s2854_s7, 16  ;;  %s1422_s19 = int_to_ptr.hbm [resolvable:$true] %s1421_s19 }
 0x100   : > { %v839_v19 = vmul.f32 0.6931472, %v1790_v25  ;;  %v956_v30 = vadd.f32 %v836_v9, %v700_v40  ;;  %v1792_v5 = vpop.eup %1791  ;;  %vm483_vm1 = vcmp.eq.f32.partialorder %v482_v39, 8.507059e+37  ;;  %v698_v25 = vmax.f32 %v2532_v53, 0.0  ;;  %s1822_s21 = sshra.s32 %s1422_s19, 4  ;;  %s1823_s21 = int_to_ptr.hbm [resolvable:$true] %s1822_s21 }
 0x101   : > { %v1224_v20 = vpop.permute.xlu0 %1223  ;;  %v1794_v17 = vpop.eup %1793  ;;  %v459_v40 = vmul.f32 %v1792_v5, %v2581_v6  ;;  %vm464_vm13 = vweird.f32 %v1792_v5  ;;  %v699_v9 = vmax.f32 %v2540_v59, 0.0  ;;  %vm714_vm4 = vcmp.ne.f32.partialorder %v2532_v53, %v2532_v53  ;;  %p1829_p0 = scmp.lt.s32.totalorder %s1823_s21, %s2854_s7 }
 0x102   : > { %v1226_v36 = vmul.f32 %v1224_v20, %v2087_v10  ;;  %v845_v24 = vsel %vm2599_vm8, %v842_v48, %v839_v19  ;;  %v972_v38 = vsel %vm716_vm5, %v2442_v15, %v956_v30  ;;  %v484_v10 = vand.u32 2147483648, %v2583_v1  ;;  %vm2637_vm15 = vmor %vm463_vm9, %vm464_vm13 }
 0x103   : > { %v957_v37 = vadd.f32 %v845_v24, %v701_v56  ;;  %v988_v33 = vsub.f32 %v972_v38, %v2442_v15  ;;  %v1100_v41 = vmul.f32 %v1084_v7, %v972_v38  ;;  %v474_v0 = vmul.f32 %v1794_v17, %v2583_v1  ;;  %v1327_v13 = vpop.permute.xlu1 %1326 }
 0x104   : > { %1230 = vperm.xlu2 %1668, %v1226_v36   ;;  %v460_v45 = vsub.f32 1.0, %v459_v40  ;;  %v1796_v47 = vpop.eup %1795  ;;  %vm479_vm14 = vweird.f32 %v1794_v17  ;;  %v485_v56 = vor.u32 1.1754944e-38, %v484_v10  ;;  %v1336_v24 = vadd.f32 %v1327_v13, %v2591_v18 }
 0x105   : > { %v973_v46 = vsel %vm717_vm6, %v2447_v8, %v957_v37  ;;  %v1068_v15 = vmul.f32 %v1052_v51, %v988_v33  ;;  %v475_v52 = vsub.f32 1.0, %v474_v0  ;;  %v1798_v55 = vpop.eup %1797  ;;  %v810_v54 = vadd.f32 1.0, %v1796_v47  ;;  %vm2643_vm0 = vmor %vm478_vm10, %vm479_vm14 }
 0x106   : > { %v989_v34 = vsub.f32 %v973_v46, %v2447_v8  ;;  %v1101_v49 = vmul.f32 %v1085_v22, %v973_v46  ;;  %v461_v28 = vmul.f32 %v1792_v5, %v460_v45  ;;  %v813_v35 = vmul.f32 -0.5, %v1796_v47  ;;  %1351 = vperm.xlu0 %1674, %v1336_v24  }
 0x107   : > { %v1116_v58 = vsub.f32 %v1068_v15, %v1100_v41  ;;  %v476_v61 = vmul.f32 %v1794_v17, %v475_v52  ;;  %v819_v8 = vadd.f32 1.0, %v1798_v55  ;;  %1799 = vlog2.f32 %v810_v54 }
 0x108   : > { %v1069_v57 = vmul.f32 %v1053_v3, %v989_v34  ;;  %v462_v62 = vadd.f32 %v1792_v5, %v461_v28  ;;  %v814_v11 = vadd.f32 1.0, %v813_v35  ;;  %v822_v12 = vmul.f32 -0.5, %v1798_v55 }
 0x109   : > { %v477_v16 = vadd.f32 %v1794_v17, %v476_v61  ;;  %1801 = vlog2.f32 %v819_v8  ;;  %v816_v50 = vand.u32 2147483647, %v1796_v47  ;;  %v825_v21 = vand.u32 2147483647, %v1798_v55 }
 0x10a   : > { %v1117_v6 = vsub.f32 %v1069_v57, %v1101_v49  ;;  %v466_v1 = vsel %vm2637_vm15, %v1792_v5, %v462_v62  ;;  %v823_v29 = vadd.f32 1.0, %v822_v12  ;;  %v1329_v22 = vsub.f32 %v2591_v18, %v1327_v13 }
 0x10b   : > { %v471_v48 = vsel %vm2624_vm11, %v470_v44, %v466_v1  ;;  %v481_v63 = vsel %vm2643_vm0, %v1794_v17, %v477_v16  ;;  %v815_v51 = vmul.f32 %v1796_v47, %v814_v11  ;;  %vm2667_vm2 = vcmp.lt.f32.partialorder %v816_v50, 0.0004427343  ;;  %v1206_v16 = vpop.permute.xlu0 %1205 }
 0x10c   : > { %1669 = vset.pattern.permute.xlu2 %v1907_v14  ;;  %v1132_v7 = vpack.c.bf16 %v1117_v6, %v1116_v58  ;;  %v486_v23 = vsel %vm483_vm1, %v485_v56, %v481_v63  ;;  %v1002_v19 = vmul.f32 %v471_v48, %v471_v48  ;;  %v1018_v30 = vsub.f32 1.0, %v471_v48  ;;  %1332 = vperm.xlu1 %1667, %v1329_v22  }
 0x10d   : > { %1284 = vperm.xlu2 %1669, %v2607_v2   ;;  %v1019_v31 = vsub.f32 1.0, %v486_v23  ;;  %v1800_v20 = vpop.eup %1799  ;;  %v824_v36 = vmul.f32 %v1798_v55, %v823_v29  ;;  %v1003_v5 = vmul.f32 %v486_v23, %v486_v23  ;;  %vm826_vm3 = vcmp.lt.f32.partialorder %v825_v21, 0.0004427343 }
 0x10e   : > { %v1147_v27 = vsel %vm1139_vm12, %v1132_v7, 0  ;;  %v812_v39 = vmul.f32 0.6931472, %v1800_v20  ;;  %v1034_v17 = vmul.f32 %v1018_v30, %v1018_v30  ;;  %v1306_v37 = vrot.slane %v2664_v26, 2 }
 0x10f   : > { %1173 = vmatpush.bf16.xpose.msra.mxu0 %v1147_v27  ;;  %v1802_v38 = vpop.eup %1801  ;;  %v1035_v40 = vmul.f32 %v1019_v31, %v1019_v31  ;;  %v1082_v41 = vmul.f32 0.75, %v1002_v19  ;;  %vm715_vm5 = vcmp.ne.f32.partialorder %v2540_v59, %v2540_v59  ;;  %v1083_v44 = vmul.f32 0.75, %v1003_v5  ;;  %v2702_v62 = vpop.permute.xlu1 %1211 }
 0x110   : > { %v821_v33 = vmul.f32 0.6931472, %v1802_v38  ;;  %v818_v10 = vsel %vm2667_vm2, %v815_v51, %v812_v39  ;;  %v1050_v46 = vmul.f32 0.25, %v1034_v17  ;;  %v1308_v15 = vadd.f32 %v1306_v37, %v2664_v26 }
 0x111   : > { %v954_v42 = vadd.f32 %v818_v10, %v698_v25  ;;  %v1051_v47 = vmul.f32 0.25, %v1035_v40  ;;  %v1203_v12 = vperm.slane %v2664_v26, 3  ;;  %v1189_v13 = vperm.slane %v2664_v26, 2 }
 0x112   : > { %v827_v18 = vsel %vm826_vm3, %v824_v36, %v821_v33  ;;  %v1195_v6 = vperm.slane %v2664_v26, 0  ;;  %v1209_v1 = vperm.slane %v2664_v26, 1 }
 0x113   : > { %v955_v0 = vadd.f32 %v827_v18, %v699_v9  ;;  %v970_v45 = vsel %vm714_vm4, %v2532_v53, %v954_v42  ;;  %v1208_v50 = vmin.f32 %v1203_v12, %v1206_v16 }
 0x114   : > { %v986_v49 = vsub.f32 %v970_v45, %v2532_v53  ;;  %v1098_v52 = vmul.f32 %v1082_v41, %v970_v45  ;;  %1672 = vset.pattern.permute.xlu1 %v1907_v14  ;;  %v1214_v7 = vmax.f32 %v1209_v1, %v2702_v62 }
 0x115   : > { %1671 = vset.pattern.permute.xlu2 %v1910_v32  ;;  %v971_v34 = vsel %vm715_vm5, %v2540_v59, %v955_v0  ;;  %1345 = vperm.xlu1 %1672, %v1329_v22   ;;  %v1309_v32 = vmul.f32 0.5, %v1308_v15 }
 0x116   : > { %1339 = vperm.xlu2 %1671, %v1336_v24   ;;  %v987_v55 = vsub.f32 %v971_v34, %v2540_v59  ;;  %v1099_v28 = vmul.f32 %v1083_v44, %v971_v34  ;;  %v1066_v56 = vmul.f32 %v1050_v46, %v986_v49  ;;  %v393_v59 = vld [vmem:[%s372_s22] sm:$0xff]  ;;  %v1215_v22 = vsub.f32 %v1208_v50, %v1214_v7  ;;  %s1824_s22 = scalar_lea.hbm %s1823_s21, 8 }
 0x117   : > { %v2686_v58 = vperm.slane %v1309_v32, 0  ;;  %v1130_v61 = vpack.c.bf16 %v393_v59, %v393_v59  ;;  %v2700_v8 = vperm.slane %v1309_v32, 1  ;;  %p1825_p11 = scmp.ne.s32.totalorder %s1823_s21, %s1824_s22  ;;  %p1830_p1 = scmp.lt.s32.totalorder %s1828_s15, %s1824_s22 }
 0x118   : > { %v1067_v54 = vmul.f32 %v1051_v47, %v987_v55  ;;  %v1114_v35 = vsub.f32 %v1066_v56, %v1098_v52  ;;  %v1216_v51 = vmax.f32 %v1215_v22, 0.0 }
 0x119   : > { %vm1320_vm7 = vcmp.gt.f32.partialorder %v2700_v8, %v2702_v62  ;;  %p1826_p12 = pnand %p1825_p11, %p1990_p5  ;;  %p1831_p2 = por %p1830_p1, %p1829_p0 }
 0x11a   : > { %v1115_v57 = vsub.f32 %v1067_v54, %v1099_v28 }
 0x11b   : > { %p1827_p13 = pneg %p1826_p12 }
 0x11c   : > { %v1131_v60 = vpack.c.bf16 %v1115_v57, %v1114_v35 }
 0x11d   : > { %p1832_p3 = pnand %p1831_p2, %p1827_p13 }
 0x11e   : > { %1673 = vset.pattern.permute.xlu2 %v1908_v43  ;;  %v1144_v14 = vsel %vm1139_vm12, %v1131_v60, 0 }
 0x11f   : > { %1300 = vperm.xlu2 %1673, %v2607_v2   ;;  %v2695_v53 = vpop.permute.xlu2 %1191  ;;  %1174 = vmatpush.bf16.xpose.msra.mxu0 %v1144_v14  ;;  %v1181_v2 = vrot.slane %v2664_v26, 6 }
 0x120   : > { %vm1317_vm6 = vcmp.lt.f32.partialorder %v2686_v58, %v2695_v53  ;;  %v1194_v29 = vmin.f32 %v1189_v13, %v2695_v53 }
 0x121   : > { %v1183_v11 = vsub.f32 %v2664_v26, %v1181_v2 }
 0x123   : > { %v1219_v48 = vrot.slane %v1183_v11, 1 }
 0x125   : > { %v1221_v23 = vmul.f32 %v1219_v48, %v1183_v11 }
 0x126   : > { %1603 = vmatmul.msk.bf16.vlgmr.msra.gmra.mxu0 %vm1139_vm12, %v1130_v61  ;;  %vm1322_vm12 = vcmp.lt.f32.partialorder %v2700_v8, %v1206_v16 }
 0x127   : > { %v1227_v27 = vperm.slane %v1221_v23, 2 }
 0x12f   : > { %v2704_v4 = vpop.permute.xlu2 %1197 }
 0x130   : > { %vm1316_vm8 = vcmp.gt.f32.partialorder %v2686_v58, %v2704_v4  ;;  %v1200_v21 = vmax.f32 %v1195_v6, %v2704_v4 }
 0x131   : > { %vm1318_vm9 = vmand %vm1316_vm8, %vm1317_vm6 }
 0x132   : > { %vm2710_vm10 = vmand %vm1318_vm9, %vm1320_vm7  ;;  %v1201_v63 = vsub.f32 %v1194_v29, %v1200_v21 }
 0x133   : > { %vm2728_vm11 = vmand %vm2710_vm10, %vm1322_vm12 }
 0x134   : > { %v1202_v9 = vmax.f32 %v1201_v63, 0.0 }
 0x136   : > { %v1217_v30 = vmul.f32 %v1216_v51, %v1202_v9 }
 0x15e   : > { %v1231_v19 = vpop.permute.xlu2 %1230 }
 0x15f   : > { %v1233_v31 = vadd.f32 %v1231_v19, %v1227_v27 }
 0x161   : > { %v2732_v20 = vsub.f32 %v1233_v31, %v1217_v30 }
 0x163   : > { %1803 = vrcp.f32 %v2732_v20  ;;  %v1246_v24 = vand.u32 2147483648, %v2732_v20  ;;  %v1244_v39 = vand.u32 2147483647, %v2732_v20  ;;  %vm1240_vm14 = vweird.f32 %v2732_v20 }
 0x165   : > { %v1247_v37 = vor.u32 1.1754944e-38, %v1246_v24  ;;  %vm1245_vm0 = vcmp.eq.f32.partialorder %v1244_v39, 8.507059e+37 }
 0x166   : > { %v1278_v41 = vpop.permute.xlu1 %1277 }
 0x169   : > { %v1804_v3 = vpop.eup %1803 }
 0x16a   : > { %v1236_v36 = vmul.f32 %v1804_v3, %v2732_v20  ;;  %vm1241_vm13 = vweird.f32 %v1804_v3 }
 0x16b   : > { %vm1242_vm15 = vmor %vm1240_vm14, %vm1241_vm13 }
 0x16c   : > { %v1237_v5 = vsub.f32 1.0, %v1236_v36 }
 0x16e   : > { %v1238_v38 = vmul.f32 %v1804_v3, %v1237_v5 }
 0x170   : > { %v1239_v17 = vadd.f32 %v1804_v3, %v1238_v38 }
 0x172   : > { %v1243_v33 = vsel %vm1242_vm15, %v1804_v3, %v1239_v17 }
 0x173   : > { %v1248_v40 = vsel %vm1245_vm0, %v1247_v37, %v1243_v33 }
 0x174   : > { %v2751_v10 = vmul.f32 %v1248_v40, %v1217_v30 }
 0x176   : > { %1386 = vst [vmem:[%s347_s17] sm:$0xff] %v2751_v10 }
 0x177   : > { %1835 = shalt.err (!%p1832_p3)
}
 0x178   : > { %1612 = dma.vmem_to_hbm [thread:$0]  (%p1990_p5), %s1420_s18, 128, %s1422_s19, %s1393_s20   ;;  %v1250_v18 = vmax.f32 %v1189_v13, %v2695_v53  ;;  %v1251_v42 = vmin.f32 %v1195_v6, %v2704_v4  ;;  %v1253_v44 = vmax.f32 %v1203_v12, %v1206_v16  ;;  %v1254_v0 = vmin.f32 %v1209_v1, %v2702_v62  ;;  %v1285_v45 = vpop.permute.xlu2 %1284  ;;  %v1293_v47 = vpop.permute.xlu0 %1292 }
 0x179   : > { %v1911_v34 = vmov 0.0   ;;  %s360_s17 = scalar_lea.vmem %s2849_s2, %s1582_s16  ;;  %s2953_s13 = sshll.u32 %s1973_s28, 3 }
 0x17a   : > { %v1252_v46 = vsub.f32 %v1250_v18, %v1251_v42  ;;  %v1255_v15 = vsub.f32 %v1253_v44, %v1254_v0  ;;  %v1356_v49 = vsel %vm2728_vm11, 1.0, %v1911_v34  ;;  %v390_v57 = vld [vmem:[%s360_s17] sm:$0xf]  ;;  %s1403_s19 = scalar_lea.hbm %s2853_s6, %s2953_s13  ;;  %s2954_s20 = sshll.u32 %s2737_s14, 3 }
 0x17b   : > { %v1357_v28 = vrot.slane %v1356_v49, 4  ;;  %v1282_v53 = vperm.slane %v390_v57, 1  ;;  %v1274_v59 = vperm.slane %v390_v57, 0  ;;  %v1290_v2 = vperm.slane %v390_v57, 2  ;;  %s340_s21 = scalar_lea.vmem [#allocation2], %s2954_s20  ;;  %s1407_s8 = sshll.u32 %s1403_s19, 4  ;;  %s1408_s8 = int_to_ptr.hbm [resolvable:$true] %s1407_s8 }
 0x17c   : > { %v2772_v52 = vmul.f32 %v1255_v15, %v1252_v46  ;;  %v1298_v16 = vperm.slane %v390_v57, 3  ;;  %s1405_s22 = sshll.u32 %s340_s21, 4  ;;  %s1388_s28 = scalar_lea.sflag [#allocation3], %s2737_s14  ;;  %s1406_s22 = int_to_ptr.vmem [resolvable:$true] %s1405_s22 }
 0x17d   : > { %v1358_v32 = vmax.f32 %v1356_v49, %v1357_v28  ;;  %v1287_v43 = vsub.f32 %v1282_v53, %v1285_v45  ;;  %v1280_v11 = vsub.f32 %v1274_v59, %v1278_v41  ;;  %v1295_v21 = vsub.f32 %v1290_v2, %v1293_v47  ;;  %s1850_s9 = sshra.s32 %s1408_s8, 4  ;;  %s1856_s17 = scalar_lea.hbm %s2853_s6, 16  ;;  %s1851_s9 = int_to_ptr.hbm [resolvable:$true] %s1850_s9 }
 0x17e   : > { %v1333_v55 = vpop.permute.xlu1 %1332  ;;  %1805 = vrcp.f32 %v2772_v52  ;;  %vm1263_vm9 = vweird.f32 %v2772_v52  ;;  %v1269_v9 = vand.u32 2147483648, %v2772_v52  ;;  %v1267_v31 = vand.u32 2147483647, %v2772_v52  ;;  %s1852_s15 = scalar_lea.hbm %s1851_s9, 8  ;;  %p1857_p9 = scmp.lt.s32.totalorder %s1851_s9, %s2853_s6 }
 0x17f   : > { %vm1335_vm1 = vcmp.gt.f32.partialorder %v2686_v58, %v1333_v55  ;;  %v1359_v60 = vrot.slane %v1358_v32, 2  ;;  %v1288_v29 = vand.u32 2147483647, %v1287_v43  ;;  %v1281_v7 = vand.u32 2147483647, %v1280_v11  ;;  %p1853_p4 = scmp.ne.s32.totalorder %s1851_s9, %s1852_s15  ;;  %p1858_p10 = scmp.lt.s32.totalorder %s1856_s17, %s1852_s15 }
 0x180   : > { %v1340_v56 = vpop.permute.xlu2 %1339  ;;  %v1352_v26 = vpop.permute.xlu0 %1351  ;;  %v1296_v27 = vand.u32 2147483647, %v1295_v21  ;;  %v1270_v5 = vor.u32 1.1754944e-38, %v1269_v9  ;;  %v1257_v38 = vsub.f32 %v2772_v52, %v2732_v20  ;;  %vm1268_vm0 = vcmp.eq.f32.partialorder %v1267_v31, 8.507059e+37 }
 0x181   : > { %vm1342_vm2 = vcmp.lt.f32.partialorder %v2686_v58, %v1340_v56  ;;  %vm1354_vm5 = vcmp.lt.f32.partialorder %v2700_v8, %v1352_v26  ;;  %v1360_v62 = vmax.f32 %v1358_v32, %v1359_v60  ;;  %v1289_v19 = vadd.f32 %v1288_v29, %v1281_v7  ;;  %p1854_p7 = pnand %p1853_p4, %p1990_p5  ;;  %p1859_p11 = por %p1858_p10, %p1857_p9 }
 0x182   : > { %vm1343_vm3 = vmand %vm1335_vm1, %vm1342_vm2 }
 0x183   : > { %v1361_v6 = vrot.slane %v1360_v62, 1  ;;  %v1297_v24 = vadd.f32 %v1296_v27, %v1289_v19  ;;  %p1855_p8 = pneg %p1854_p7 }
 0x184   : > { %v1806_v35 = vpop.eup %1805 }
 0x185   : > { %v1259_v61 = vmul.f32 %v1806_v35, %v2772_v52  ;;  %v1362_v22 = vmax.f32 %v1360_v62, %v1361_v6  ;;  %vm1264_vm10 = vweird.f32 %v1806_v35  ;;  %p1860_p12 = pnand %p1859_p11, %p1855_p8 }
 0x186   : > { %vm1265_vm12 = vmor %vm1263_vm9, %vm1264_vm10 }
 0x187   : > { %v1346_v54 = vpop.permute.xlu1 %1345  ;;  %v1260_v12 = vsub.f32 1.0, %v1259_v61  ;;  %vm1363_vm13 = vcmp.gt.f32.partialorder %v1362_v22, 0.0 }
 0x188   : > { %vm1348_vm4 = vcmp.gt.f32.partialorder %v2700_v8, %v1346_v54  ;;  %v1301_v1 = vpop.permute.xlu2 %1300 }
 0x189   : > { %vm1349_vm6 = vmand %vm1343_vm3, %vm1348_vm4  ;;  %v1261_v48 = vmul.f32 %v1806_v35, %v1260_v12  ;;  %v1303_v23 = vsub.f32 %v1298_v16, %v1301_v1 }
 0x18a   : > { %vm2784_vm7 = vmand %vm1349_vm6, %vm1354_vm5 }
 0x18b   : > { %v1364_v58 = vsel %vm2784_vm7, 1.0, %v1911_v34  ;;  %vm1373_vm8 = vmand %vm2728_vm11, %vm2784_vm7  ;;  %v1262_v30 = vadd.f32 %v1806_v35, %v1261_v48  ;;  %v1304_v3 = vand.u32 2147483647, %v1303_v23 }
 0x18c   : > { %v1365_v4 = vrot.slane %v1364_v58, 4 }
 0x18d   : > { %v1266_v39 = vsel %vm1265_vm12, %v1806_v35, %v1262_v30  ;;  %v1305_v17 = vadd.f32 %v1304_v3, %v1297_v24 }
 0x18e   : > { %v1366_v8 = vmax.f32 %v1364_v58, %v1365_v4  ;;  %v1271_v37 = vsel %vm1268_vm0, %v1270_v5, %v1266_v39 }
 0x18f   : > { %v1272_v33 = vmul.f32 %v1271_v37, %v1257_v38  ;;  %v1374_v40 = vmul.f32 5.0, %v1305_v17 }
 0x190   : > { %v1367_v13 = vrot.slane %v1366_v8, 2 }
 0x191   : > { %v1273_v41 = vsub.f32 %v2751_v10, %v1272_v33 }
 0x192   : > { %v1368_v50 = vmax.f32 %v1366_v8, %v1367_v13 }
 0x193   : > { %v1377_v0 = vmul.f32 2.0, %v1273_v41 }
 0x194   : > { %v1369_v63 = vrot.slane %v1368_v50, 1 }
 0x196   : > { %v1370_v51 = vmax.f32 %v1368_v50, %v1369_v63 }
 0x198   : > { %vm1371_vm14 = vcmp.gt.f32.partialorder %v1370_v51, 0.0 }
 0x199   : > { %vm2798_vm15 = vmor %vm1363_vm13, %vm1371_vm14 }
 0x1a3   : > { %v1176_v18 = vpop.f32.mrf.mxu0 }
 0x1a4   : > { %v1375_v42 = vmul.f32 2.0, %v1176_v18 }
 0x1a6   : > { %v1376_v44 = vadd.f32 %v1375_v42, %v1374_v40 }
 0x1a8   : > { %v1378_v46 = vsub.f32 %v1376_v44, %v1377_v0 }
 0x1aa   : > { %v1379_v20 = vadd.f32 100.0, %v1378_v46 }
 0x1ab   : > { %v1178_v15 = vpop.f32.mrf.mxu0 }
 0x1ac   : > { %v1380_v10 = vsel %vm1373_vm8, %v1378_v46, %v1379_v20 }
 0x1ad   : > { %v1381_v45 = vadd.f32 10000.0, %v1380_v10 }
 0x1af   : > { %v1384_v47 = vsel %vm2798_vm15, %v1380_v10, %v1381_v45 }
 0x1b0   : > { %1385 = vst [vmem:[%s340_s21] sm:$0xff] %v1384_v47 }
 0x1b1   : > { %1863 = shalt.err (!%p1860_p12)
}
 0x1b2   : > { %1611 = dma.vmem_to_hbm [thread:$0]  (%p1990_p5), %s1406_s22, 128, %s1408_s8, %s1388_s28  }
 0x1b3 PF: > { %p1622_p13 = scmp.ge.s32.totalorder %s1902_s27, 2  ;;  %s1433_s14 = sand.u32 1, %s1890_s24  }
 0x1b4   : > { %s1434_s18 = scalar_lea.sflag [#allocation3], %s1433_s14 }
 0x1b5   : > { %p1616_p0 = pnand %p1622_p13, %p1994_p6 }
 0x1b7   : > { %p1617_p1 = pneg %p1616_p0 }
 0x1b9   : > { %1881 = dma.done.wait (%p1617_p1), %s1434_s18, 128  }
 0x1ba   : > { %1883 = vsyncadd (%p1617_p1), %s1434_s18, 4294967168  ;;  %s1444_s19 = scalar_lea.sflag [#allocation5], %s1433_s14 }
 0x1bb   : > { %1885 = dma.done.wait (%p1617_p1), %s1444_s19, 128  }
 0x1bc   : > { %1887 = vsyncadd (%p1617_p1), %s1444_s19, 4294967168  ;;  %p21_p5 = scmp.ge.s32.totalorder %s1977_s30, 4   ;;  %s2955_s24 = smov %s1894_s25 }
 0x1bd   : > { %s2956_s25 = smov %s1898_s26  ;;  %s2957_s26 = smov %s1988_s10 }
 0x1be   : > { %s2958_s27 = smov %s1977_s30  ;;  %23 = sbr.rel (!%p21_p5) target bundleno = 5 (0x5), region = 111 }
 0x1c3   :  { %1450 = vsyncpa [#allocation3], 1 }
 0x1c4   :  { %1452 = vsyncpa [#allocation3 + $0x1], 1 }
 0x1c5   :  { %1453 = vsyncpa [#allocation5], 1 }
 0x1c6   :  { %1455 = vsyncpa [#allocation5 + $0x1], 1 }

</bundles_post_ra>
